<compile_context>
chip_gen: v6e
topology: v6e:2x2x1
jax: 0.10.0
libtpu: 0.0.40
codegen_flags: <defaults>
</compile_context>

<pallas_src>
import functools

import jax
import jax.numpy as jnp
from jax import lax
from jax.experimental import pallas as pl
from jax.experimental.pallas import tpu as pltpu


_INV_SQRT2 = 0.7071067811865476  # hoisted constant for the exact (erf) GELU


def _gelu_erf(x):
    # PyTorch nn.GELU() default: exact (erf) formulation.
    return 0.5 * x * (1.0 + lax.erf(x * _INV_SQRT2))


# Mirrors the PyTorch module's ACTIVATION dict (demo uses 'gelu').
# 'gelu_tanh' is the EUP-friendly approximation (preferable on v5e when the
# kernel is VPU-bound and exact PyTorch erf parity is not required).
_ACT = {
    "gelu": _gelu_erf,
    "gelu_tanh": lambda x: jax.nn.gelu(x, approximate=True),
    "tanh": jnp.tanh,
    "sigmoid": jax.nn.sigmoid,
    "relu": lambda x: jnp.maximum(x, 0.0),
    "leaky_relu": lambda x: jnp.where(x >= 0, x, 0.1 * x),
    "softplus": jax.nn.softplus,
    "ELU": jax.nn.elu,
    "silu": jax.nn.silu,
}

# Static unroll up to this many hidden layers; beyond, use lax.fori_loop so
# vreg live ranges stay bounded.
_UNROLL_LAYER_LIMIT = 8


def _round_up(x, m):
    return ((x + m - 1) // m) * m


def mlp_kernel(x_ref, wpre_ref, bpre_ref, wmid_ref, bmid_ref,
               wpost_ref, bpost_ref, o_ref, *, n_layers, res, act_fn,
               compute_dtype):
    # x_ref: (tm, Ci) row tile, already in compute_dtype.
    # All weights are VMEM-resident across grid steps (constant index_maps).
    x = x_ref[...]

    # linear_pre + act (MXU in compute_dtype, f32 accumulation; bias/act in f32)
    h = jnp.dot(x, wpre_ref[...], preferred_element_type=jnp.float32)
    h = act_fn(h + bpre_ref[...])

    def layer(l, h):
        y = jnp.dot(h.astype(compute_dtype), wmid_ref[l],
                    preferred_element_type=jnp.float32) + bmid_ref[l]
        y = act_fn(y)
        return y + h if res else y

    if n_layers <= _UNROLL_LAYER_LIMIT:
        for l in range(n_layers):        # compile-time constant -> static unroll
            h = layer(l, h)
    else:
        h = lax.fori_loop(0, n_layers, layer, h)   # bounded live ranges

    # linear_post (no activation); output lanes padded to a 128-multiple.
    out = jnp.dot(h.astype(compute_dtype), wpost_ref[...],
                  preferred_element_type=jnp.float32) + bpost_ref[...]
    o_ref[...] = out.astype(o_ref.dtype)


def mlp_pallas(x, params, *, n_layers, res=True, act="gelu", tm=256,
               compute_dtype=jnp.bfloat16, single_buffer_weights=True):
    """Fused MLP forward.

    x: [..., n_input] float32. params: dict from init_params (f32 masters).
    Matmul operands are cast to `compute_dtype` (bf16 by default) for the MXU;
    accumulation, bias, activation and residual stay in f32.
    """
    assert n_layers >= 1
    act_fn = _ACT[act]

    lead_shape = x.shape[:-1]
    n_input = x.shape[-1]
    out_dtype = x.dtype
    x2d = x.reshape(-1, n_input).astype(compute_dtype)   # pre-cast once in XLA
    M = x2d.shape[0]

    wpre, bpre = params["wpre"], params["bpre"]      # (Ci,H), (1,H)
    wmid, bmid = params["wmid"], params["bmid"]      # (L,H,H), (L,1,H)
    wpost, bpost = params["wpost"], params["bpost"]  # (H,Co), (1,Co)
    H = wpre.shape[1]
    n_output = wpost.shape[1]

    # Row tile: MXU-shaped (256-multiple) when there is enough work; otherwise
    # a single grid step (no forced split on single-TC chips / tiny M).
    if M <= tm:
        tm = _round_up(max(M, 8), 8)
    else:
        tm = _round_up(tm, 256)
    Mp = _round_up(M, tm)
    if Mp != M:
        x2d = jnp.pad(x2d, ((0, Mp - M), (0, 0)))

    # Lane-dense hidden width and output width: pad H and n_output up to a
    # multiple of 128. Padded weight rows/cols and biases are zero, so padded
    # lanes never contaminate real outputs (even for acts with act(0) != 0,
    # because the padded wmid/wpost ROWS are zero).
    Hp = _round_up(H, 128)
    Np = _round_up(n_output, 128)
    ph = Hp - H
    pn = Np - n_output
    wpre_p = jnp.pad(wpre, ((0, 0), (0, ph)))
    bpre_p = jnp.pad(bpre, ((0, 0), (0, ph)))
    wmid_p = jnp.pad(wmid, ((0, 0), (0, ph), (0, ph)))
    bmid_p = jnp.pad(bmid, ((0, 0), (0, 0), (0, ph)))
    wpost_p = jnp.pad(wpost, ((0, ph), (0, pn)))
    bpost_p = jnp.pad(bpost, ((0, 0), (0, pn)))

    # bf16 (or f32) matmul operands; biases stay f32.
    wpre_c = wpre_p.astype(compute_dtype)
    wmid_c = wmid_p.astype(compute_dtype)
    wpost_c = wpost_p.astype(compute_dtype)
    bpre_f = bpre_p.astype(jnp.float32)
    bmid_f = bmid_p.astype(jnp.float32)
    bpost_f = bpost_p.astype(jnp.float32)

    kernel = functools.partial(mlp_kernel, n_layers=n_layers, res=res,
                               act_fn=act_fn, compute_dtype=compute_dtype)

    # --- VMEM budget (conservative: assume 2 buffers even when Buffered(1)) ---
    c_bytes = jnp.dtype(compute_dtype).itemsize
    o_bytes = jnp.dtype(out_dtype).itemsize
    weight_bytes = (wpre_c.size + wmid_c.size + wpost_c.size) * c_bytes
    bias_bytes = (bpre_f.size + bmid_f.size + bpost_f.size) * 4
    io_bytes = 2 * tm * n_input * c_bytes + 2 * tm * Np * o_bytes
    act_bytes = 6 * tm * Hp * 4                      # f32 h/y working set
    needed = int(1.3 * (2 * (weight_bytes + bias_bytes) + io_bytes + act_bytes))
    vmem_limit = int(min(max(needed, 32 << 20), 64 << 20))

    # --- Cost estimate (hint for XLA scheduling around the custom call) ---
    flops = 2 * Mp * (n_input * Hp + n_layers * Hp * Hp + Hp * Np)
    transcendentals = Mp * Hp * (n_layers + 1)
    bytes_accessed = (x2d.size * c_bytes + weight_bytes + bias_bytes
                      + Mp * Np * o_bytes)
    cost = pl.CostEstimate(flops=int(flops),
                           transcendentals=int(transcendentals),
                           bytes_accessed=int(bytes_accessed))

    grid = (Mp // tm,)

    def _const_spec(a, single_buf):
        idx = (lambda i: (0, 0)) if a.ndim == 2 else (lambda i: (0, 0, 0))
        if single_buf:
            # index_map is constant -> a single buffer halves resident VMEM.
            return pl.BlockSpec(a.shape, idx, pipeline_mode=pl.Buffered(1))
        return pl.BlockSpec(a.shape, idx)

    def _call(single_buf):
        in_specs = [
            pl.BlockSpec((tm, n_input), lambda i: (i, 0)),   # x row tile
            _const_spec(wpre_c, single_buf), _const_spec(bpre_f, single_buf),
            _const_spec(wmid_c, single_buf), _const_spec(bmid_f, single_buf),
            _const_spec(wpost_c, single_buf), _const_spec(bpost_f, single_buf),
        ]
        return pl.pallas_call(
            kernel,
            out_shape=jax.ShapeDtypeStruct((Mp, Np), out_dtype),
            grid_spec=pltpu.PrefetchScalarGridSpec(
                num_scalar_prefetch=0,
                grid=grid,
                in_specs=in_specs,
                out_specs=pl.BlockSpec((tm, Np), lambda i: (i, 0)),
            ),
            compiler_params=pltpu.CompilerParams(
                dimension_semantics=("parallel",),
                vmem_limit_bytes=vmem_limit),
            cost_estimate=cost,
        )(x2d, wpre_c, bpre_f, wmid_c, bmid_f, wpost_c, bpost_f)

    try:
        out_p = _call(single_buffer_weights)
    except Exception:
        # Fallback: default (double-buffered) weight specs.
        out_p = _call(False)

    out = out_p[:M, :n_output]
    return out.reshape(*lead_shape, n_output)


def init_params(key, n_input, n_hidden, n_output, n_layers):
    """Deterministic init matching nn.Linear's default uniform bounds (f32)."""
    ks = jax.random.split(key, 2 * (n_layers + 2))
    ki = iter(ks)

    def linear(kw, kb, fan_in, fan_out):
        bound = 1.0 / jnp.sqrt(jnp.float32(fan_in))
        w = jax.random.uniform(kw, (fan_in, fan_out), jnp.float32, -bound, bound)
        b = jax.random.uniform(kb, (1, fan_out), jnp.float32, -bound, bound)
        return w, b

    wpre, bpre = linear(next(ki), next(ki), n_input, n_hidden)
    wmid, bmid = [], []
    for _ in range(n_layers):
        w, b = linear(next(ki), next(ki), n_hidden, n_hidden)
        wmid.append(w)
        bmid.append(b)
    wpost, bpost = linear(next(ki), next(ki), n_hidden, n_output)
    return {
        "wpre": wpre, "bpre": bpre,
        "wmid": jnp.stack(wmid, axis=0),      # (L, H, H)
        "bmid": jnp.stack(bmid, axis=0),      # (L, 1, H)
        "wpost": wpost, "bpost": bpost,
    }


def mlp_reference(x, params, *, n_layers, res=True, act="gelu"):
    act_fn = _ACT[act]
    h = act_fn(x @ params["wpre"] + params["bpre"])
    for l in range(n_layers):
        y = act_fn(h @ params["wmid"][l] + params["bmid"][l])
        h = y + h if res else y
    return h @ params["wpost"] + params["bpost"]


if __name__ == "__main__":
    key = jax.random.PRNGKey(0)
    kx, kp, kx2, kp2 = jax.random.split(key, 4)

    # --- Config 1: small shapes consistent with the module (S=60 is
    #     deliberately non-tile-aligned). Static-unroll layer path. ---
    B, S = 2, 60
    n_input, n_hidden, n_output, n_layers = 16, 32, 8, 2
    res = True

    x = jax.random.normal(kx, (B, S, n_input), jnp.float32)
    params = init_params(kp, n_input, n_hidden, n_output, n_layers)
    ref = mlp_reference(x, params, n_layers=n_layers, res=res)

    # f32 compute path: tight check vs. the reference.
    out_f32 = mlp_pallas(x, params, n_layers=n_layers, res=res,
                         compute_dtype=jnp.float32)
    jax.block_until_ready(out_f32)
    assert out_f32.shape == (B, S, n_output)
    assert jnp.allclose(out_f32, ref, atol=1e-4, rtol=1e-4), "f32 mismatch"

    # bf16 compute path (default, faster): relaxed tolerance vs. f32 reference.
    out_bf = mlp_pallas(x, params, n_layers=n_layers, res=res)
    jax.block_until_ready(out_bf)
    assert out_bf.shape == (B, S, n_output)
    assert jnp.allclose(out_bf, ref, atol=5e-2, rtol=5e-2), "bf16 mismatch"

    # --- Config 2: deeper MLP exercising the fori_loop layer path, row
    #     padding, and a multi-step grid (M=600 > tm=256). ---
    B2, S2, nl2 = 2, 300, 10
    x2 = jax.random.normal(kx2, (B2, S2, n_input), jnp.float32)
    params2 = init_params(kp2, n_input, n_hidden, n_output, nl2)
    ref2 = mlp_reference(x2, params2, n_layers=nl2, res=res)
    out2 = mlp_pallas(x2, params2, n_layers=nl2, res=res,
                      compute_dtype=jnp.float32)
    jax.block_until_ready(out2)
    assert out2.shape == (B2, S2, n_output)
    assert jnp.allclose(out2, ref2, atol=2e-3, rtol=2e-3), "deep-MLP mismatch"

    print("KERNEL_OK")
</pallas_src>

<mosaic_0001>
module attributes {stable_mosaic.version = 11 : i64} {
  func.func @mlp_kernel(%arg0: i32, %arg1: memref<120x16xf32, #tpu.memory_space<vmem>>, %arg2: memref<16x128xf32, #tpu.memory_space<vmem>>, %arg3: memref<1x128xf32, #tpu.memory_space<vmem>>, %arg4: memref<2x128x128xf32, #tpu.memory_space<vmem>>, %arg5: memref<2x1x128xf32, #tpu.memory_space<vmem>>, %arg6: memref<128x128xf32, #tpu.memory_space<vmem>>, %arg7: memref<1x128xf32, #tpu.memory_space<vmem>>, %arg8: memref<120x128xf32, #tpu.memory_space<vmem>>) attributes {dimension_semantics = [#tpu.dimension_semantics<parallel>], iteration_bounds = array<i64: 1>, scalar_prefetch = 0 : i64, scratch_operands = 0 : i64, tpu.core_type = #tpu.core_type<tc>, window_params = [{transform_indices = @transform_0, window_bounds = array<i64: 120, 16>}, {pipeline_mode = #tpu.pipeline_mode<synchronous>, transform_indices = @transform_1, window_bounds = array<i64: 16, 128>}, {pipeline_mode = #tpu.pipeline_mode<synchronous>, transform_indices = @transform_2, window_bounds = array<i64: 1, 128>}, {pipeline_mode = #tpu.pipeline_mode<synchronous>, transform_indices = @transform_3, window_bounds = array<i64: 2, 128, 128>}, {pipeline_mode = #tpu.pipeline_mode<synchronous>, transform_indices = @transform_4, window_bounds = array<i64: 2, 1, 128>}, {pipeline_mode = #tpu.pipeline_mode<synchronous>, transform_indices = @transform_5, window_bounds = array<i64: 128, 128>}, {pipeline_mode = #tpu.pipeline_mode<synchronous>, transform_indices = @transform_6, window_bounds = array<i64: 1, 128>}, {transform_indices = @transform_7, window_bounds = array<i64: 120, 128>}]} {
    %c0 = arith.constant 0 : index
    %c0_0 = arith.constant 0 : index
    %0 = vector.load %arg1[%c0, %c0_0] : memref<120x16xf32, #tpu.memory_space<vmem>>, vector<120x16xf32>
    %c0_1 = arith.constant 0 : index
    %c0_2 = arith.constant 0 : index
    %1 = vector.load %arg2[%c0_1, %c0_2] : memref<16x128xf32, #tpu.memory_space<vmem>>, vector<16x128xf32>
    %cst = arith.constant dense<0.000000e+00> : vector<120x128xf32>
    %2 = tpu.matmul %0, %1, %cst {dimension_numbers = #tpu.dot_dimension_numbers<[1], [0], [0], [1], [0, 0, 1, 1], [], []>} : vector<120x16xf32>, vector<16x128xf32>, vector<120x128xf32> -> vector<120x128xf32>
    %c0_3 = arith.constant 0 : index
    %c0_4 = arith.constant 0 : index
    %3 = vector.load %arg3[%c0_3, %c0_4] : memref<1x128xf32, #tpu.memory_space<vmem>>, vector<1x128xf32>
    %4 = vector.broadcast %3 : vector<1x128xf32> to vector<120x128xf32>
    %5 = arith.addf %2, %4 : vector<120x128xf32>
    %cst_5 = arith.constant 5.000000e-01 : f32
    %6 = vector.broadcast %cst_5 : f32 to vector<120x128xf32>
    %7 = arith.mulf %6, %5 : vector<120x128xf32>
    %cst_6 = arith.constant 0.707106769 : f32
    %8 = vector.broadcast %cst_6 : f32 to vector<120x128xf32>
    %9 = arith.mulf %5, %8 : vector<120x128xf32>
    %10 = math.erf %9 : vector<120x128xf32>
    %cst_7 = arith.constant 1.000000e+00 : f32
    %11 = vector.broadcast %cst_7 : f32 to vector<120x128xf32>
    %12 = arith.addf %11, %10 : vector<120x128xf32>
    %13 = arith.mulf %7, %12 : vector<120x128xf32>
    %c0_8 = arith.constant 0 : index
    %c0_9 = arith.constant 0 : index
    %c0_10 = arith.constant 0 : index
    %14 = vector.load %arg4[%c0_8, %c0_9, %c0_10] : memref<2x128x128xf32, #tpu.memory_space<vmem>>, vector<1x128x128xf32>
    %15 = vector.shape_cast %14 : vector<1x128x128xf32> to vector<128x128xf32>
    %cst_11 = arith.constant dense<0.000000e+00> : vector<120x128xf32>
    %16 = tpu.matmul %13, %15, %cst_11 {dimension_numbers = #tpu.dot_dimension_numbers<[1], [0], [0], [1], [0, 0, 1, 1], [], []>} : vector<120x128xf32>, vector<128x128xf32>, vector<120x128xf32> -> vector<120x128xf32>
    %c0_12 = arith.constant 0 : index
    %c0_13 = arith.constant 0 : index
    %c0_14 = arith.constant 0 : index
    %17 = vector.load %arg5[%c0_12, %c0_13, %c0_14] : memref<2x1x128xf32, #tpu.memory_space<vmem>>, vector<1x1x128xf32>
    %18 = vector.shape_cast %17 : vector<1x1x128xf32> to vector<1x128xf32>
    %19 = vector.broadcast %18 : vector<1x128xf32> to vector<120x128xf32>
    %20 = arith.addf %16, %19 : vector<120x128xf32>
    %cst_15 = arith.constant 5.000000e-01 : f32
    %21 = vector.broadcast %cst_15 : f32 to vector<120x128xf32>
    %22 = arith.mulf %21, %20 : vector<120x128xf32>
    %cst_16 = arith.constant 0.707106769 : f32
    %23 = vector.broadcast %cst_16 : f32 to vector<120x128xf32>
    %24 = arith.mulf %20, %23 : vector<120x128xf32>
    %25 = math.erf %24 : vector<120x128xf32>
    %cst_17 = arith.constant 1.000000e+00 : f32
    %26 = vector.broadcast %cst_17 : f32 to vector<120x128xf32>
    %27 = arith.addf %26, %25 : vector<120x128xf32>
    %28 = arith.mulf %22, %27 : vector<120x128xf32>
    %29 = arith.addf %28, %13 : vector<120x128xf32>
    %c1 = arith.constant 1 : index
    %c0_18 = arith.constant 0 : index
    %c0_19 = arith.constant 0 : index
    %30 = vector.load %arg4[%c1, %c0_18, %c0_19] : memref<2x128x128xf32, #tpu.memory_space<vmem>>, vector<1x128x128xf32>
    %31 = vector.shape_cast %30 : vector<1x128x128xf32> to vector<128x128xf32>
    %cst_20 = arith.constant dense<0.000000e+00> : vector<120x128xf32>
    %32 = tpu.matmul %29, %31, %cst_20 {dimension_numbers = #tpu.dot_dimension_numbers<[1], [0], [0], [1], [0, 0, 1, 1], [], []>} : vector<120x128xf32>, vector<128x128xf32>, vector<120x128xf32> -> vector<120x128xf32>
    %c1_21 = arith.constant 1 : index
    %c0_22 = arith.constant 0 : index
    %c0_23 = arith.constant 0 : index
    %33 = vector.load %arg5[%c1_21, %c0_22, %c0_23] : memref<2x1x128xf32, #tpu.memory_space<vmem>>, vector<1x1x128xf32>
    %34 = vector.shape_cast %33 : vector<1x1x128xf32> to vector<1x128xf32>
    %35 = vector.broadcast %34 : vector<1x128xf32> to vector<120x128xf32>
    %36 = arith.addf %32, %35 : vector<120x128xf32>
    %cst_24 = arith.constant 5.000000e-01 : f32
    %37 = vector.broadcast %cst_24 : f32 to vector<120x128xf32>
    %38 = arith.mulf %37, %36 : vector<120x128xf32>
    %cst_25 = arith.constant 0.707106769 : f32
    %39 = vector.broadcast %cst_25 : f32 to vector<120x128xf32>
    %40 = arith.mulf %36, %39 : vector<120x128xf32>
    %41 = math.erf %40 : vector<120x128xf32>
    %cst_26 = arith.constant 1.000000e+00 : f32
    %42 = vector.broadcast %cst_26 : f32 to vector<120x128xf32>
    %43 = arith.addf %42, %41 : vector<120x128xf32>
    %44 = arith.mulf %38, %43 : vector<120x128xf32>
    %45 = arith.addf %44, %29 : vector<120x128xf32>
    %c0_27 = arith.constant 0 : index
    %c0_28 = arith.constant 0 : index
    %46 = vector.load %arg6[%c0_27, %c0_28] : memref<128x128xf32, #tpu.memory_space<vmem>>, vector<128x128xf32>
    %cst_29 = arith.constant dense<0.000000e+00> : vector<120x128xf32>
    %47 = tpu.matmul %45, %46, %cst_29 {dimension_numbers = #tpu.dot_dimension_numbers<[1], [0], [0], [1], [0, 0, 1, 1], [], []>} : vector<120x128xf32>, vector<128x128xf32>, vector<120x128xf32> -> vector<120x128xf32>
    %c0_30 = arith.constant 0 : index
    %c0_31 = arith.constant 0 : index
    %48 = vector.load %arg7[%c0_30, %c0_31] : memref<1x128xf32, #tpu.memory_space<vmem>>, vector<1x128xf32>
    %49 = vector.broadcast %48 : vector<1x128xf32> to vector<120x128xf32>
    %50 = arith.addf %47, %49 : vector<120x128xf32>
    %c0_32 = arith.constant 0 : index
    %c0_33 = arith.constant 0 : index
    %51 = vector.load %arg8[%c0_32, %c0_33] : memref<120x128xf32, #tpu.memory_space<vmem>>, vector<120x128xf32>
    tpu.vector_store %arg8[%c0_32, %c0_33], %50 {strides = array<i32>} : memref<120x128xf32, #tpu.memory_space<vmem>>, vector<120x128xf32>,
    return
  }
  func.func @transform_0(%arg0: i32) -> (i32, i32) {
    %c0_i32 = arith.constant 0 : i32
    %c0_i32_0 = arith.constant 0 : i32
    return %arg0, %c0_i32 : i32, i32
  }
  func.func @transform_1(%arg0: i32) -> (i32, i32) {
    %c0_i32 = arith.constant 0 : i32
    %c0_i32_0 = arith.constant 0 : i32
    %c0_i32_1 = arith.constant 0 : i32
    return %c0_i32, %c0_i32_0 : i32, i32
  }
  func.func @transform_2(%arg0: i32) -> (i32, i32) {
    %c0_i32 = arith.constant 0 : i32
    %c0_i32_0 = arith.constant 0 : i32
    %c0_i32_1 = arith.constant 0 : i32
    return %c0_i32, %c0_i32_0 : i32, i32
  }
  func.func @transform_3(%arg0: i32) -> (i32, i32, i32) {
    %c0_i32 = arith.constant 0 : i32
    %c0_i32_0 = arith.constant 0 : i32
    %c0_i32_1 = arith.constant 0 : i32
    %c0_i32_2 = arith.constant 0 : i32
    return %c0_i32, %c0_i32_0, %c0_i32_1 : i32, i32, i32
  }
  func.func @transform_4(%arg0: i32) -> (i32, i32, i32) {
    %c0_i32 = arith.constant 0 : i32
    %c0_i32_0 = arith.constant 0 : i32
    %c0_i32_1 = arith.constant 0 : i32
    %c0_i32_2 = arith.constant 0 : i32
    return %c0_i32, %c0_i32_0, %c0_i32_1 : i32, i32, i32
  }
  func.func @transform_5(%arg0: i32) -> (i32, i32) {
    %c0_i32 = arith.constant 0 : i32
    %c0_i32_0 = arith.constant 0 : i32
    %c0_i32_1 = arith.constant 0 : i32
    return %c0_i32, %c0_i32_0 : i32, i32
  }
  func.func @transform_6(%arg0: i32) -> (i32, i32) {
    %c0_i32 = arith.constant 0 : i32
    %c0_i32_0 = arith.constant 0 : i32
    %c0_i32_1 = arith.constant 0 : i32
    return %c0_i32, %c0_i32_0 : i32, i32
  }
  func.func @transform_7(%arg0: i32) -> (i32, i32) {
    %c0_i32 = arith.constant 0 : i32
    %c0_i32_0 = arith.constant 0 : i32
    return %arg0, %c0_i32 : i32, i32
  }
}

module attributes {stable_mosaic.version = 11 : i64} {
  func.func @mlp_kernel(%arg0: i32, %arg1: memref<120x16xf32, #tpu.memory_space<vmem>>, %arg2: memref<16x128xf32, #tpu.memory_space<vmem>>, %arg3: memref<1x128xf32, #tpu.memory_space<vmem>>, %arg4: memref<2x128x128xf32, #tpu.memory_space<vmem>>, %arg5: memref<2x1x128xf32, #tpu.memory_space<vmem>>, %arg6: memref<128x128xf32, #tpu.memory_space<vmem>>, %arg7: memref<1x128xf32, #tpu.memory_space<vmem>>, %arg8: memref<120x128xf32, #tpu.memory_space<vmem>>) attributes {dimension_semantics = [#tpu.dimension_semantics<parallel>], iteration_bounds = array<i64: 1>, scalar_prefetch = 0 : i64, scratch_operands = 0 : i64, tpu.core_type = #tpu.core_type<tc>, window_params = [{transform_indices = @transform_0, window_bounds = array<i64: 120, 16>}, {pipeline_mode = #tpu.pipeline_mode<synchronous>, transform_indices = @transform_1, window_bounds = array<i64: 16, 128>}, {pipeline_mode = #tpu.pipeline_mode<synchronous>, transform_indices = @transform_2, window_bounds = array<i64: 1, 128>}, {pipeline_mode = #tpu.pipeline_mode<synchronous>, transform_indices = @transform_3, window_bounds = array<i64: 2, 128, 128>}, {pipeline_mode = #tpu.pipeline_mode<synchronous>, transform_indices = @transform_4, window_bounds = array<i64: 2, 1, 128>}, {pipeline_mode = #tpu.pipeline_mode<synchronous>, transform_indices = @transform_5, window_bounds = array<i64: 128, 128>}, {pipeline_mode = #tpu.pipeline_mode<synchronous>, transform_indices = @transform_6, window_bounds = array<i64: 1, 128>}, {transform_indices = @transform_7, window_bounds = array<i64: 120, 128>}]} {
    %c0 = arith.constant 0 : index
    %c0_0 = arith.constant 0 : index
    %0 = vector.load %arg1[%c0, %c0_0] : memref<120x16xf32, #tpu.memory_space<vmem>>, vector<120x16xf32>
    %c0_1 = arith.constant 0 : index
    %c0_2 = arith.constant 0 : index
    %1 = vector.load %arg2[%c0_1, %c0_2] : memref<16x128xf32, #tpu.memory_space<vmem>>, vector<16x128xf32>
    %cst = arith.constant dense<0.000000e+00> : vector<120x128xf32>
    %2 = tpu.matmul %0, %1, %cst {dimension_numbers = #tpu.dot_dimension_numbers<[1], [0], [0], [1], [0, 0, 1, 1], [], []>} : vector<120x16xf32>, vector<16x128xf32>, vector<120x128xf32> -> vector<120x128xf32>
    %c0_3 = arith.constant 0 : index
    %c0_4 = arith.constant 0 : index
    %3 = vector.load %arg3[%c0_3, %c0_4] : memref<1x128xf32, #tpu.memory_space<vmem>>, vector<1x128xf32>
    %4 = vector.broadcast %3 : vector<1x128xf32> to vector<120x128xf32>
    %5 = arith.addf %2, %4 : vector<120x128xf32>
    %cst_5 = arith.constant 5.000000e-01 : f32
    %6 = vector.broadcast %cst_5 : f32 to vector<120x128xf32>
    %7 = arith.mulf %6, %5 : vector<120x128xf32>
    %cst_6 = arith.constant 0.707106769 : f32
    %8 = vector.broadcast %cst_6 : f32 to vector<120x128xf32>
    %9 = arith.mulf %5, %8 : vector<120x128xf32>
    %10 = math.erf %9 : vector<120x128xf32>
    %cst_7 = arith.constant 1.000000e+00 : f32
    %11 = vector.broadcast %cst_7 : f32 to vector<120x128xf32>
    %12 = arith.addf %11, %10 : vector<120x128xf32>
    %13 = arith.mulf %7, %12 : vector<120x128xf32>
    %c0_8 = arith.constant 0 : index
    %c0_9 = arith.constant 0 : index
    %c0_10 = arith.constant 0 : index
    %14 = vector.load %arg4[%c0_8, %c0_9, %c0_10] : memref<2x128x128xf32, #tpu.memory_space<vmem>>, vector<1x128x128xf32>
    %15 = vector.shape_cast %14 : vector<1x128x128xf32> to vector<128x128xf32>
    %cst_11 = arith.constant dense<0.000000e+00> : vector<120x128xf32>
    %16 = tpu.matmul %13, %15, %cst_11 {dimension_numbers = #tpu.dot_dimension_numbers<[1], [0], [0], [1], [0, 0, 1, 1], [], []>} : vector<120x128xf32>, vector<128x128xf32>, vector<120x128xf32> -> vector<120x128xf32>
    %c0_12 = arith.constant 0 : index
    %c0_13 = arith.constant 0 : index
    %c0_14 = arith.constant 0 : index
    %17 = vector.load %arg5[%c0_12, %c0_13, %c0_14] : memref<2x1x128xf32, #tpu.memory_space<vmem>>, vector<1x1x128xf32>
    %18 = vector.shape_cast %17 : vector<1x1x128xf32> to vector<1x128xf32>
    %19 = vector.broadcast %18 : vector<1x128xf32> to vector<120x128xf32>
    %20 = arith.addf %16, %19 : vector<120x128xf32>
    %cst_15 = arith.constant 5.000000e-01 : f32
    %21 = vector.broadcast %cst_15 : f32 to vector<120x128xf32>
    %22 = arith.mulf %21, %20 : vector<120x128xf32>
    %cst_16 = arith.constant 0.707106769 : f32
    %23 = vector.broadcast %cst_16 : f32 to vector<120x128xf32>
    %24 = arith.mulf %20, %23 : vector<120x128xf32>
    %25 = math.erf %24 : vector<120x128xf32>
    %cst_17 = arith.constant 1.000000e+00 : f32
    %26 = vector.broadcast %cst_17 : f32 to vector<120x128xf32>
    %27 = arith.addf %26, %25 : vector<120x128xf32>
    %28 = arith.mulf %22, %27 : vector<120x128xf32>
    %29 = arith.addf %28, %13 : vector<120x128xf32>
    %c1 = arith.constant 1 : index
    %c0_18 = arith.constant 0 : index
    %c0_19 = arith.constant 0 : index
    %30 = vector.load %arg4[%c1, %c0_18, %c0_19] : memref<2x128x128xf32, #tpu.memory_space<vmem>>, vector<1x128x128xf32>
    %31 = vector.shape_cast %30 : vector<1x128x128xf32> to vector<128x128xf32>
    %cst_20 = arith.constant dense<0.000000e+00> : vector<120x128xf32>
    %32 = tpu.matmul %29, %31, %cst_20 {dimension_numbers = #tpu.dot_dimension_numbers<[1], [0], [0], [1], [0, 0, 1, 1], [], []>} : vector<120x128xf32>, vector<128x128xf32>, vector<120x128xf32> -> vector<120x128xf32>
    %c1_21 = arith.constant 1 : index
    %c0_22 = arith.constant 0 : index
    %c0_23 = arith.constant 0 : index
    %33 = vector.load %arg5[%c1_21, %c0_22, %c0_23] : memref<2x1x128xf32, #tpu.memory_space<vmem>>, vector<1x1x128xf32>
    %34 = vector.shape_cast %33 : vector<1x1x128xf32> to vector<1x128xf32>
    %35 = vector.broadcast %34 : vector<1x128xf32> to vector<120x128xf32>
    %36 = arith.addf %32, %35 : vector<120x128xf32>
    %cst_24 = arith.constant 5.000000e-01 : f32
    %37 = vector.broadcast %cst_24 : f32 to vector<120x128xf32>
    %38 = arith.mulf %37, %36 : vector<120x128xf32>
    %cst_25 = arith.constant 0.707106769 : f32
    %39 = vector.broadcast %cst_25 : f32 to vector<120x128xf32>
    %40 = arith.mulf %36, %39 : vector<120x128xf32>
    %41 = math.erf %40 : vector<120x128xf32>
    %cst_26 = arith.constant 1.000000e+00 : f32
    %42 = vector.broadcast %cst_26 : f32 to vector<120x128xf32>
    %43 = arith.addf %42, %41 : vector<120x128xf32>
    %44 = arith.mulf %38, %43 : vector<120x128xf32>
    %45 = arith.addf %44, %29 : vector<120x128xf32>
    %c0_27 = arith.constant 0 : index
    %c0_28 = arith.constant 0 : index
    %46 = vector.load %arg6[%c0_27, %c0_28] : memref<128x128xf32, #tpu.memory_space<vmem>>, vector<128x128xf32>
    %cst_29 = arith.constant dense<0.000000e+00> : vector<120x128xf32>
    %47 = tpu.matmul %45, %46, %cst_29 {dimension_numbers = #tpu.dot_dimension_numbers<[1], [0], [0], [1], [0, 0, 1, 1], [], []>} : vector<120x128xf32>, vector<128x128xf32>, vector<120x128xf32> -> vector<120x128xf32>
    %c0_30 = arith.constant 0 : index
    %c0_31 = arith.constant 0 : index
    %48 = vector.load %arg7[%c0_30, %c0_31] : memref<1x128xf32, #tpu.memory_space<vmem>>, vector<1x128xf32>
    %49 = vector.broadcast %48 : vector<1x128xf32> to vector<120x128xf32>
    %50 = arith.addf %47, %49 : vector<120x128xf32>
    %c0_32 = arith.constant 0 : index
    %c0_33 = arith.constant 0 : index
    %51 = vector.load %arg8[%c0_32, %c0_33] : memref<120x128xf32, #tpu.memory_space<vmem>>, vector<120x128xf32>
    tpu.vector_store %arg8[%c0_32, %c0_33], %50 {strides = array<i32>} : memref<120x128xf32, #tpu.memory_space<vmem>>, vector<120x128xf32>,
    return
  }
  func.func @transform_0(%arg0: i32) -> (i32, i32) {
    %c0_i32 = arith.constant 0 : i32
    %c0_i32_0 = arith.constant 0 : i32
    return %arg0, %c0_i32 : i32, i32
  }
  func.func @transform_1(%arg0: i32) -> (i32, i32) {
    %c0_i32 = arith.constant 0 : i32
    %c0_i32_0 = arith.constant 0 : i32
    %c0_i32_1 = arith.constant 0 : i32
    return %c0_i32, %c0_i32_0 : i32, i32
  }
  func.func @transform_2(%arg0: i32) -> (i32, i32) {
    %c0_i32 = arith.constant 0 : i32
    %c0_i32_0 = arith.constant 0 : i32
    %c0_i32_1 = arith.constant 0 : i32
    return %c0_i32, %c0_i32_0 : i32, i32
  }
  func.func @transform_3(%arg0: i32) -> (i32, i32, i32) {
    %c0_i32 = arith.constant 0 : i32
    %c0_i32_0 = arith.constant 0 : i32
    %c0_i32_1 = arith.constant 0 : i32
    %c0_i32_2 = arith.constant 0 : i32
    return %c0_i32, %c0_i32_0, %c0_i32_1 : i32, i32, i32
  }
  func.func @transform_4(%arg0: i32) -> (i32, i32, i32) {
    %c0_i32 = arith.constant 0 : i32
    %c0_i32_0 = arith.constant 0 : i32
    %c0_i32_1 = arith.constant 0 : i32
    %c0_i32_2 = arith.constant 0 : i32
    return %c0_i32, %c0_i32_0, %c0_i32_1 : i32, i32, i32
  }
  func.func @transform_5(%arg0: i32) -> (i32, i32) {
    %c0_i32 = arith.constant 0 : i32
    %c0_i32_0 = arith.constant 0 : i32
    %c0_i32_1 = arith.constant 0 : i32
    return %c0_i32, %c0_i32_0 : i32, i32
  }
  func.func @transform_6(%arg0: i32) -> (i32, i32) {
    %c0_i32 = arith.constant 0 : i32
    %c0_i32_0 = arith.constant 0 : i32
    %c0_i32_1 = arith.constant 0 : i32
    return %c0_i32, %c0_i32_0 : i32, i32
  }
  func.func @transform_7(%arg0: i32) -> (i32, i32) {
    %c0_i32 = arith.constant 0 : i32
    %c0_i32_0 = arith.constant 0 : i32
    return %arg0, %c0_i32 : i32, i32
  }
}

</mosaic_0001>

<bundles_post_ra>
// kernel: tpu_custom_call.1
= control target key start
LH: loop header
LB: loop body
LE: loop exit
PB: predicated region body
PF: predicated region fallthrough
CT: control target
= control target key end

     0   :  { %12 = vsyncpa [#allocation3], 0  ;;  %s2223_s0 = inlined_call_operand.vmem [shape: f32[120,16], index: 0, kind: input, shape index: {}]   ;;  %s2224_s1 = inlined_call_operand.vmem [shape: f32[16,128], index: 1, kind: input, shape index: {}]   ;;  %s2225_s2 = inlined_call_operand.vmem [shape: f32[1,128], index: 2, kind: input, shape index: {}]   ;;  %s2226_s3 = inlined_call_operand.hbm [shape: f32[2,128,128], index: 3, kind: input, shape index: {}]   ;;  %s2227_s4 = inlined_call_operand.hbm [shape: f32[2,1,128], index: 4, kind: input, shape index: {}]   ;;  %s2228_s5 = inlined_call_operand.vmem [shape: f32[128,128], index: 5, kind: input, shape index: {}]   ;;  %s2229_s6 = inlined_call_operand.vmem [shape: f32[1,128], index: 6, kind: input, shape index: {}]   ;;  %s2230_s7 = inlined_call_operand.hbm [shape: f32[120,128], index: 7, kind: output, shape index: {}]  }
   0x1   :  { %13 = vsyncpa [#allocation6], 0 }
   0x2   :  { %14 = vsyncpa [#allocation4], 0  ;;  %s1650_s24 = smov [#allocation2]  }
   0x3   :  { %s26_s25 = sshll.u32 %s1650_s24, 4  ;;  %s27_s25 = int_to_ptr.vmem [resolvable:$true] %s26_s25 }
   0x4   :  { %s1592_s26 = scalar_lea.vmem %s27_s25, 4096  ;;  %p1597_p1 = scmp.lt.s32.totalorder %s27_s25, %s27_s25 }
   0x5   :  { %p1593_p0 = scmp.ne.s32.totalorder %s27_s25, %s1592_s26  ;;  %p1598_p2 = scmp.lt.s32.totalorder %s1592_s26, %s1592_s26 }
   0x7   :  { %p1599_p3 = por %p1598_p2, %p1597_p1 }
   0x9   :  { %p1600_p4 = pnand %p1599_p3, %p1593_p0 }
   0xb   :  { %1603 = shalt.err (!%p1600_p4)
}
   0xc   :  { %s1651_s27 = smov 128   ;;  %s1652_s28 = smov 8  }
   0xd   :  { %32 = dma.hbm_to_vmem [thread:$0]  %s2226_s3, 4096, %s27_s25, [#allocation3], %s1651_s27, %s1651_s27, %s1652_s28  }
   0xe   :  { %s1653_s8 = smov [#allocation5]  }
   0xf   :  { %s38_s9 = sshll.u32 %s1653_s8, 4  ;;  %s39_s9 = int_to_ptr.vmem [resolvable:$true] %s38_s9 }
  0x10   :  { %s1612_s10 = scalar_lea.vmem %s39_s9, 32  ;;  %p1617_p6 = scmp.lt.s32.totalorder %s39_s9, %s39_s9 }
  0x11   :  { %p1613_p5 = scmp.ne.s32.totalorder %s39_s9, %s1612_s10  ;;  %p1618_p7 = scmp.lt.s32.totalorder %s1612_s10, %s1612_s10 }
  0x13   :  { %p1619_p8 = por %p1618_p7, %p1617_p6 }
  0x15   :  { %p1620_p9 = pnand %p1619_p8, %p1613_p5 }
  0x17   :  { %1623 = shalt.err (!%p1620_p9)
}
  0x18   :  { %s1654_s11 = smov 16   ;;  %s1655_s12 = smov 1  }
  0x19   :  { %44 = dma.hbm_to_vmem [thread:$0]  %s2227_s4, 32, %s39_s9, [#allocation6], %s1654_s11, %s1654_s11, %s1655_s12  }
  0x1a   :  { %1644 = dma.done.wait [#allocation3], 4096  }
  0x1b   :  { %1645 = vsyncadd [#allocation3], 4294963200 }
  0x1c   :  { %1646 = dma.done.wait [#allocation6], 32  }
  0x1d   :  { %1647 = vsyncadd [#allocation6], 4294967264  ;;  %v1656_v0 = vmov 0.0   ;;  %vm1657_vm0 = vmmov 0   ;;  %v71_v1 = vld [vmem:[%s2224_s1 + $0x8] sm:$0xff]  ;;  %v70_v2 = vld [vmem:[%s2224_s1] sm:$0xff] }
  0x1e   :  { %1173 = vmatprep.subr.mxu0 %v1656_v0  ;;  %1177 = vmatprep.mubr.msk.f32.mxu0 %vm1657_vm0, %v1656_v0  ;;  %v55_v3 = vld [vmem:[%s2223_s0] sm:$0xff]  ;;  %vm79_vm1 = vcmask 130048   ;;  %v56_v4 = vld [vmem:[%s2223_s0 + $0x8] sm:$0xff]  ;;  %v355_v5 = vld [vmem:[#allocation2 + $0x78] sm:$0xff] }
  0x1f   :  { %1222 = vmatprep.subr.mxu1 %v1656_v0  ;;  %1254 = vmatprep.mubr.msk.f32.mxu1 %vm1657_vm0, %v1656_v0  ;;  %v354_v6 = vld [vmem:[#allocation2 + $0x70] sm:$0xff]  ;;  %v353_v7 = vld [vmem:[#allocation2 + $0x68] sm:$0xff]  ;;  %v352_v9 = vld [vmem:[#allocation2 + $0x60] sm:$0xff] }
  0x20   :  { %1174 = vmatpush3.msra.mxu0 %v71_v1  ;;  %1223 = vmatpush3.msra.mxu1 %v355_v5  ;;  %v57_v8 = vld [vmem:[%s2223_s0 + $0x10] sm:$0xff]  ;;  %v58_v10 = vld [vmem:[%s2223_s0 + $0x18] sm:$0xff]  ;;  %v59_v11 = vld [vmem:[%s2223_s0 + $0x20] sm:$0xff] }
  0x21   :  { %1175 = vmatprep.subr.mxu0 %v1656_v0  ;;  %1224 = vmatprep.subr.mxu1 %v1656_v0  ;;  %v60_v12 = vld [vmem:[%s2223_s0 + $0x28] sm:$0xff]  ;;  %v61_v13 = vld [vmem:[%s2223_s0 + $0x30] sm:$0xff]  ;;  %v62_v14 = vld [vmem:[%s2223_s0 + $0x38] sm:$0xff] }
  0x22   :  { %1176 = vmatpush3.msra.mxu0 %v70_v2  ;;  %1225 = vmatpush3.msra.mxu1 %v354_v6  ;;  %v63_v15 = vld [vmem:[%s2223_s0 + $0x40] sm:$0xff]  ;;  %v64_v16 = vld [vmem:[%s2223_s0 + $0x48] sm:$0xff]  ;;  %v65_v17 = vld [vmem:[%s2223_s0 + $0x50] sm:$0xff] }
  0x23   :  { %1178 = vmatmul.mubr.msk.f32.vlgmr.msra.gmra.mxu0 %vm79_vm1, %v55_v3  ;;  %1299 = vmatprep.subr.mxu0 %v1656_v0  ;;  %v66_v18 = vld [vmem:[%s2223_s0 + $0x58] sm:$0xff]  ;;  %v67_v19 = vld [vmem:[%s2223_s0 + $0x60] sm:$0xff]  ;;  %v68_v20 = vld [vmem:[%s2223_s0 + $0x68] sm:$0xff] }
  0x24   :  { %1180 = vmatprep.mubr.msk.f32.mxu0 %vm1657_vm0, %v1656_v0  ;;  %1226 = vmatprep.subr.mxu1 %v1656_v0  ;;  %v69_v21 = vld [vmem:[%s2223_s0 + $0x70] sm:$0xff]  ;;  %v351_v22 = vld [vmem:[#allocation2 + $0x58] sm:$0xff]  ;;  %v349_v24 = vld [vmem:[#allocation2 + $0x48] sm:$0xff] }
  0x25   :  { %1227 = vmatpush3.msra.mxu1 %v353_v7  ;;  %v350_v23 = vld [vmem:[#allocation2 + $0x50] sm:$0xff]  ;;  %v348_v25 = vld [vmem:[#allocation2 + $0x40] sm:$0xff]  ;;  %v347_v26 = vld [vmem:[#allocation2 + $0x38] sm:$0xff] }
  0x26   :  { %1228 = vmatprep.subr.mxu1 %v1656_v0  ;;  %v346_v27 = vld [vmem:[#allocation2 + $0x30] sm:$0xff]  ;;  %v345_v28 = vld [vmem:[#allocation2 + $0x28] sm:$0xff]  ;;  %v344_v29 = vld [vmem:[#allocation2 + $0x20] sm:$0xff] }
  0x27   :  { %1181 = vmatmul.mubr.msk.f32.gmra.mxu0 %vm79_vm1, %v56_v4  ;;  %1229 = vmatpush3.msra.mxu1 %v352_v9  ;;  %v343_v30 = vld [vmem:[#allocation2 + $0x18] sm:$0xff]  ;;  %v342_v31 = vld [vmem:[#allocation2 + $0x10] sm:$0xff]  ;;  %v341_v32 = vld [vmem:[#allocation2 + $0x8] sm:$0xff] }
  0x28   :  { %1183 = vmatprep.mubr.msk.f32.mxu0 %vm1657_vm0, %v1656_v0  ;;  %1230 = vmatprep.subr.mxu1 %v1656_v0  ;;  %v340_v33 = vld [vmem:[#allocation2] sm:$0xff]  ;;  %v609_v34 = vld [vmem:[#allocation2 + $0xf8] sm:$0xff]  ;;  %v608_v35 = vld [vmem:[#allocation2 + $0xf0] sm:$0xff] }
  0x29   :  { %1231 = vmatpush3.msra.mxu1 %v351_v22  ;;  %1300 = vmatpush3.msra.mxu0 %v609_v34  ;;  %v607_v36 = vld [vmem:[#allocation2 + $0xe8] sm:$0xff]  ;;  %v606_v37 = vld [vmem:[#allocation2 + $0xe0] sm:$0xff]  ;;  %v605_v38 = vld [vmem:[#allocation2 + $0xd8] sm:$0xff] }
  0x2a   :  { %1232 = vmatprep.subr.mxu1 %v1656_v0  ;;  %1301 = vmatprep.subr.mxu0 %v1656_v0  ;;  %v604_v39 = vld [vmem:[#allocation2 + $0xd0] sm:$0xff]  ;;  %v603_v40 = vld [vmem:[#allocation2 + $0xc8] sm:$0xff]  ;;  %v602_v41 = vld [vmem:[#allocation2 + $0xc0] sm:$0xff] }
  0x2b   :  { %1184 = vmatmul.mubr.msk.f32.gmra.mxu0 %vm79_vm1, %v57_v8  ;;  %1233 = vmatpush3.msra.mxu1 %v350_v23  ;;  %v601_v42 = vld [vmem:[#allocation2 + $0xb8] sm:$0xff]  ;;  %v600_v43 = vld [vmem:[#allocation2 + $0xb0] sm:$0xff]  ;;  %v1841_v44 = vld [vmem:[%s2225_s2] ss:$0 sm:$0xff] }
  0x2c   :  { %1186 = vmatprep.mubr.msk.f32.mxu0 %vm1657_vm0, %v1656_v0  ;;  %1234 = vmatprep.subr.mxu1 %v1656_v0 }
  0x2d   :  { %1235 = vmatpush3.msra.mxu1 %v349_v24  ;;  %1302 = vmatpush3.msra.mxu0 %v608_v35 }
  0x2e   :  { %1236 = vmatprep.subr.mxu1 %v1656_v0  ;;  %1303 = vmatprep.subr.mxu0 %v1656_v0 }
  0x2f   :  { %1187 = vmatmul.mubr.msk.f32.gmra.mxu0 %vm79_vm1, %v58_v10  ;;  %1237 = vmatpush3.msra.mxu1 %v348_v25 }
  0x30   :  { %1189 = vmatprep.mubr.msk.f32.mxu0 %vm1657_vm0, %v1656_v0  ;;  %1238 = vmatprep.subr.mxu1 %v1656_v0 }
  0x31   :  { %1239 = vmatpush3.msra.mxu1 %v347_v26  ;;  %1304 = vmatpush3.msra.mxu0 %v607_v36 }
  0x32   :  { %1240 = vmatprep.subr.mxu1 %v1656_v0  ;;  %1305 = vmatprep.subr.mxu0 %v1656_v0 }
  0x33   :  { %1190 = vmatmul.mubr.msk.f32.gmra.mxu0 %vm79_vm1, %v59_v11  ;;  %1241 = vmatpush3.msra.mxu1 %v346_v27 }
  0x34   :  { %1192 = vmatprep.mubr.msk.f32.mxu0 %vm1657_vm0, %v1656_v0  ;;  %1242 = vmatprep.subr.mxu1 %v1656_v0 }
  0x35   :  { %1243 = vmatpush3.msra.mxu1 %v345_v28  ;;  %1306 = vmatpush3.msra.mxu0 %v606_v37 }
  0x36   :  { %1244 = vmatprep.subr.mxu1 %v1656_v0  ;;  %1307 = vmatprep.subr.mxu0 %v1656_v0 }
  0x37   :  { %1193 = vmatmul.mubr.msk.f32.gmra.mxu0 %vm79_vm1, %v60_v12  ;;  %1245 = vmatpush3.msra.mxu1 %v344_v29 }
  0x38   :  { %1195 = vmatprep.mubr.msk.f32.mxu0 %vm1657_vm0, %v1656_v0  ;;  %1246 = vmatprep.subr.mxu1 %v1656_v0 }
  0x39   :  { %1247 = vmatpush3.msra.mxu1 %v343_v30  ;;  %1308 = vmatpush3.msra.mxu0 %v605_v38 }
  0x3a   :  { %1248 = vmatprep.subr.mxu1 %v1656_v0  ;;  %1309 = vmatprep.subr.mxu0 %v1656_v0 }
  0x3b   :  { %1196 = vmatmul.mubr.msk.f32.gmra.mxu0 %vm79_vm1, %v61_v13  ;;  %1249 = vmatpush3.msra.mxu1 %v342_v31 }
  0x3c   :  { %1198 = vmatprep.mubr.msk.f32.mxu0 %vm1657_vm0, %v1656_v0  ;;  %1250 = vmatprep.subr.mxu1 %v1656_v0 }
  0x3d   :  { %1251 = vmatpush3.msra.mxu1 %v341_v32  ;;  %1310 = vmatpush3.msra.mxu0 %v604_v39 }
  0x3e   :  { %1252 = vmatprep.subr.mxu1 %v1656_v0  ;;  %1311 = vmatprep.subr.mxu0 %v1656_v0 }
  0x3f   :  { %1199 = vmatmul.mubr.msk.f32.gmra.mxu0 %vm79_vm1, %v62_v14  ;;  %1253 = vmatpush3.msra.mxu1 %v340_v33 }
  0x40   :  { %1201 = vmatprep.mubr.msk.f32.mxu0 %vm1657_vm0, %v1656_v0  ;;  %1453 = vmatprep.subr.mxu1 %v1656_v0 }
  0x41   :  { %1312 = vmatpush3.msra.mxu0 %v603_v40 }
  0x42   :  { %1313 = vmatprep.subr.mxu0 %v1656_v0 }
  0x43   :  { %1202 = vmatmul.mubr.msk.f32.gmra.mxu0 %vm79_vm1, %v63_v15 }
  0x44   :  { %1204 = vmatprep.mubr.msk.f32.mxu0 %vm1657_vm0, %v1656_v0  ;;  %1314 = vmatpush3.msra.mxu0 %v602_v41 }
  0x45   :  { %1315 = vmatprep.subr.mxu0 %v1656_v0 }
  0x46   :  { %1316 = vmatpush3.msra.mxu0 %v601_v42 }
  0x47   :  { %1205 = vmatmul.mubr.msk.f32.gmra.mxu0 %vm79_vm1, %v64_v16  ;;  %1317 = vmatprep.subr.mxu0 %v1656_v0 }
  0x48   :  { %1207 = vmatprep.mubr.msk.f32.mxu0 %vm1657_vm0, %v1656_v0  ;;  %1318 = vmatpush3.msra.mxu0 %v600_v43 }
  0x49   :  { %1319 = vmatprep.subr.mxu0 %v1656_v0 }
  0x4b   :  { %1208 = vmatmul.mubr.msk.f32.gmra.mxu0 %vm79_vm1, %v65_v17 }
  0x4c   :  { %1210 = vmatprep.mubr.msk.f32.mxu0 %vm1657_vm0, %v1656_v0 }
  0x4f   :  { %1211 = vmatmul.mubr.msk.f32.gmra.mxu0 %vm79_vm1, %v66_v18 }
  0x50   :  { %1213 = vmatprep.mubr.msk.f32.mxu0 %vm1657_vm0, %v1656_v0 }
  0x53   :  { %1214 = vmatmul.mubr.msk.f32.gmra.mxu0 %vm79_vm1, %v67_v19 }
  0x54   :  { %1216 = vmatprep.mubr.msk.f32.mxu0 %vm1657_vm0, %v1656_v0 }
  0x57   :  { %1217 = vmatmul.mubr.msk.f32.gmra.mxu0 %vm79_vm1, %v68_v20 }
  0x58   :  { %1219 = vmatprep.mubr.msk.f32.mxu0 %vm1657_vm0, %v1656_v0 }
  0x5b   :  { %1220 = vmatmul.mubr.msk.f32.gmra.mxu0 %vm79_vm1, %v69_v21 }
  0x5c   :  { %1331 = vmatprep.mubr.msk.f32.mxu0 %vm1657_vm0, %v1656_v0 }
  0xe3   :  { %v191_v45 = vpop.f32.mrf.mxu0 }
  0xe4   :  { %v192_v46 = vadd.f32 %v1841_v44, %v191_v45 }
  0xe5   :  { %v1179_v47 = vpop.f32.mrf.mxu0 }
  0xe6   :  { %v280_v48 = vmul.f32 0.70710677, %v192_v46  ;;  %v265_v2 = vmul.f32 0.5, %v192_v46 }
  0xe7   :  { %v196_v49 = vpop.f32.mrf.mxu0 }
  0xe8   :  { %1494 = verf.f32 %v280_v48  ;;  %v197_v50 = vadd.f32 %v1841_v44, %v196_v49 }
  0xe9   :  { %v1182_v51 = vpop.f32.mrf.mxu0 }
  0xea   :  { %v281_v52 = vmul.f32 0.70710677, %v197_v50  ;;  %v266_v10 = vmul.f32 0.5, %v197_v50 }
  0xeb   :  { %v201_v53 = vpop.f32.mrf.mxu0 }
  0xec   :  { %1496 = verf.f32 %v281_v52  ;;  %v202_v54 = vadd.f32 %v1841_v44, %v201_v53 }
  0xed   :  { %v1185_v55 = vpop.f32.mrf.mxu0 }
  0xee   :  { %v282_v56 = vmul.f32 0.70710677, %v202_v54  ;;  %v267_v18 = vmul.f32 0.5, %v202_v54 }
  0xef   :  { %v206_v57 = vpop.f32.mrf.mxu0 }
  0xf0   :  { %1498 = verf.f32 %v282_v56  ;;  %v207_v58 = vadd.f32 %v1841_v44, %v206_v57 }
  0xf1   :  { %v1188_v59 = vpop.f32.mrf.mxu0 }
  0xf2   :  { %v283_v60 = vmul.f32 0.70710677, %v207_v58  ;;  %v268_v26 = vmul.f32 0.5, %v207_v58 }
  0xf3   :  { %v211_v61 = vpop.f32.mrf.mxu0 }
  0xf4   :  { %1500 = verf.f32 %v283_v60  ;;  %v212_v62 = vadd.f32 %v1841_v44, %v211_v61 }
  0xf5   :  { %v1495_v63 = vpop.eup %1494  ;;  %v1191_v1 = vpop.f32.mrf.mxu0 }
  0xf6   :  { %v284_v3 = vmul.f32 0.70710677, %v212_v62  ;;  %v310_v4 = vadd.f32 1.0, %v1495_v63  ;;  %v269_v34 = vmul.f32 0.5, %v212_v62 }
  0xf7   :  { %v216_v5 = vpop.f32.mrf.mxu0 }
  0xf8   :  { %1502 = verf.f32 %v284_v3  ;;  %v217_v6 = vadd.f32 %v1841_v44, %v216_v5  ;;  %v1849_v7 = vmul.f32 %v310_v4, %v265_v2 }
  0xf9   :  { %v1497_v8 = vpop.eup %1496  ;;  %v1194_v9 = vpop.f32.mrf.mxu0 }
  0xfa   :  { %v285_v11 = vmul.f32 0.70710677, %v217_v6  ;;  %1255 = vmatmul.mubr.f32.vlgmr.msra.gmra.mxu1 %v1849_v7  ;;  %v311_v12 = vadd.f32 1.0, %v1497_v8  ;;  %v270_v42 = vmul.f32 0.5, %v217_v6 }
  0xfb   :  { %v221_v13 = vpop.f32.mrf.mxu0  ;;  %1257 = vmatprep.mubr.msk.f32.mxu1 %vm1657_vm0, %v1656_v0 }
  0xfc   :  { %1504 = verf.f32 %v285_v11  ;;  %v222_v14 = vadd.f32 %v1841_v44, %v221_v13  ;;  %v1855_v15 = vmul.f32 %v311_v12, %v266_v10 }
  0xfd   :  { %v1499_v16 = vpop.eup %1498  ;;  %v1197_v17 = vpop.f32.mrf.mxu0 }
  0xfe   :  { %v286_v19 = vmul.f32 0.70710677, %v222_v14  ;;  %1258 = vmatmul.mubr.f32.gmra.mxu1 %v1855_v15  ;;  %v312_v20 = vadd.f32 1.0, %v1499_v16  ;;  %v271_v51 = vmul.f32 0.5, %v222_v14 }
  0xff   :  { %v226_v21 = vpop.f32.mrf.mxu0  ;;  %1260 = vmatprep.mubr.msk.f32.mxu1 %vm1657_vm0, %v1656_v0 }
 0x100   :  { %1506 = verf.f32 %v286_v19  ;;  %v227_v22 = vadd.f32 %v1841_v44, %v226_v21  ;;  %v1861_v23 = vmul.f32 %v312_v20, %v267_v18 }
 0x101   :  { %v1501_v24 = vpop.eup %1500  ;;  %v1200_v25 = vpop.f32.mrf.mxu0 }
 0x102   :  { %v287_v27 = vmul.f32 0.70710677, %v227_v22  ;;  %1261 = vmatmul.mubr.f32.gmra.mxu1 %v1861_v23  ;;  %v313_v28 = vadd.f32 1.0, %v1501_v24  ;;  %v272_v59 = vmul.f32 0.5, %v227_v22 }
 0x103   :  { %v231_v29 = vpop.f32.mrf.mxu0  ;;  %1263 = vmatprep.mubr.msk.f32.mxu1 %vm1657_vm0, %v1656_v0 }
 0x104   :  { %1508 = verf.f32 %v287_v27  ;;  %v232_v30 = vadd.f32 %v1841_v44, %v231_v29  ;;  %v1867_v31 = vmul.f32 %v313_v28, %v268_v26 }
 0x105   :  { %v1503_v32 = vpop.eup %1502  ;;  %v1203_v33 = vpop.f32.mrf.mxu0 }
 0x106   :  { %v288_v35 = vmul.f32 0.70710677, %v232_v30  ;;  %1264 = vmatmul.mubr.f32.gmra.mxu1 %v1867_v31  ;;  %v314_v36 = vadd.f32 1.0, %v1503_v32  ;;  %v273_v4 = vmul.f32 0.5, %v232_v30 }
 0x107   :  { %v236_v37 = vpop.f32.mrf.mxu0  ;;  %1266 = vmatprep.mubr.msk.f32.mxu1 %vm1657_vm0, %v1656_v0 }
 0x108   :  { %1510 = verf.f32 %v288_v35  ;;  %v237_v38 = vadd.f32 %v1841_v44, %v236_v37  ;;  %v1873_v39 = vmul.f32 %v314_v36, %v269_v34 }
 0x109   :  { %v1505_v40 = vpop.eup %1504  ;;  %v1206_v41 = vpop.f32.mrf.mxu0 }
 0x10a   :  { %v289_v43 = vmul.f32 0.70710677, %v237_v38  ;;  %1267 = vmatmul.mubr.f32.gmra.mxu1 %v1873_v39  ;;  %v315_v45 = vadd.f32 1.0, %v1505_v40  ;;  %v274_v13 = vmul.f32 0.5, %v237_v38 }
 0x10b   :  { %v241_v46 = vpop.f32.mrf.mxu0  ;;  %1269 = vmatprep.mubr.msk.f32.mxu1 %vm1657_vm0, %v1656_v0 }
 0x10c   :  { %1512 = verf.f32 %v289_v43  ;;  %v242_v47 = vadd.f32 %v1841_v44, %v241_v46  ;;  %v1879_v48 = vmul.f32 %v315_v45, %v270_v42  ;;  %v599_v45 = vld [vmem:[#allocation2 + $0xa8] sm:$0xff]  ;;  %v598_v46 = vld [vmem:[#allocation2 + $0xa0] sm:$0xff] }
 0x10d   :  { %v1507_v49 = vpop.eup %1506  ;;  %v1209_v50 = vpop.f32.mrf.mxu0  ;;  %1320 = vmatpush3.msra.mxu0 %v599_v45 }
 0x10e   :  { %v290_v52 = vmul.f32 0.70710677, %v242_v47  ;;  %1270 = vmatmul.mubr.f32.gmra.mxu1 %v1879_v48  ;;  %v316_v53 = vadd.f32 1.0, %v1507_v49  ;;  %v275_v22 = vmul.f32 0.5, %v242_v47  ;;  %1321 = vmatprep.subr.mxu0 %v1656_v0  ;;  %v597_v47 = vld [vmem:[#allocation2 + $0x98] sm:$0xff]  ;;  %v596_v49 = vld [vmem:[#allocation2 + $0x90] sm:$0xff] }
 0x10f   :  { %v246_v54 = vpop.f32.mrf.mxu0  ;;  %1272 = vmatprep.mubr.msk.f32.mxu1 %vm1657_vm0, %v1656_v0  ;;  %1322 = vmatpush3.msra.mxu0 %v598_v46  ;;  %v595_v50 = vld [vmem:[#allocation2 + $0x88] sm:$0xff] }
 0x110   :  { %1514 = verf.f32 %v290_v52  ;;  %v247_v55 = vadd.f32 %v1841_v44, %v246_v54  ;;  %v1885_v56 = vmul.f32 %v316_v53, %v271_v51  ;;  %1323 = vmatprep.subr.mxu0 %v1656_v0  ;;  %v594_v51 = vld [vmem:[#allocation2 + $0x80] sm:$0xff]  ;;  %v1942_v52 = vld [vmem:[%s2228_s5 + $0x78] sm:$0xff]  ;;  %v1949_v53 = vld [vmem:[%s2228_s5 + $0x70] sm:$0xff] }
 0x111   :  { %v1509_v57 = vpop.eup %1508  ;;  %v1212_v58 = vpop.f32.mrf.mxu0  ;;  %1324 = vmatpush3.msra.mxu0 %v597_v47  ;;  %1469 = vmatpush3.msra.mxu1 %v1942_v52  ;;  %v1956_v54 = vld [vmem:[%s2228_s5 + $0x68] sm:$0xff] }
 0x112   :  { %v291_v60 = vmul.f32 0.70710677, %v247_v55  ;;  %1273 = vmatmul.mubr.f32.gmra.mxu1 %v1885_v56  ;;  %v317_v61 = vadd.f32 1.0, %v1509_v57  ;;  %v276_v28 = vmul.f32 0.5, %v247_v55  ;;  %1325 = vmatprep.subr.mxu0 %v1656_v0  ;;  %v1963_v55 = vld [vmem:[%s2228_s5 + $0x60] sm:$0xff]  ;;  %v1970_v57 = vld [vmem:[%s2228_s5 + $0x58] sm:$0xff] }
 0x113   :  { %v251_v62 = vpop.f32.mrf.mxu0  ;;  %1275 = vmatprep.mubr.msk.f32.mxu1 %vm1657_vm0, %v1656_v0  ;;  %1326 = vmatpush3.msra.mxu0 %v596_v49  ;;  %v1977_v58 = vld [vmem:[%s2228_s5 + $0x50] sm:$0xff] }
 0x114   :  { %1516 = verf.f32 %v291_v60  ;;  %v252_v63 = vadd.f32 %v1841_v44, %v251_v62  ;;  %v1891_v1 = vmul.f32 %v317_v61, %v272_v59  ;;  %1327 = vmatprep.subr.mxu0 %v1656_v0  ;;  %1454 = vmatprep.subr.mxu1 %v1656_v0  ;;  %v1981_v59 = vld [vmem:[#allocation5] ss:$0 sm:$0xff] }
 0x115   :  { %v1511_v2 = vpop.eup %1510  ;;  %v1215_v3 = vpop.f32.mrf.mxu0  ;;  %1328 = vmatpush3.msra.mxu0 %v595_v50  ;;  %1470 = vmatpush3.msra.mxu1 %v1949_v53 }
 0x116   :  { %v292_v5 = vmul.f32 0.70710677, %v252_v63  ;;  %1276 = vmatmul.mubr.f32.gmra.mxu1 %v1891_v1  ;;  %v318_v6 = vadd.f32 1.0, %v1511_v2  ;;  %v277_v32 = vmul.f32 0.5, %v252_v63  ;;  %1329 = vmatprep.subr.mxu0 %v1656_v0 }
 0x117   :  { %v256_v8 = vpop.f32.mrf.mxu0  ;;  %1278 = vmatprep.mubr.msk.f32.mxu1 %vm1657_vm0, %v1656_v0  ;;  %1330 = vmatpush3.msra.mxu0 %v594_v51 }
 0x118   :  { %1518 = verf.f32 %v292_v5  ;;  %v257_v9 = vadd.f32 %v1841_v44, %v256_v8  ;;  %v1897_v10 = vmul.f32 %v318_v6, %v273_v4  ;;  %1376 = vmatprep.subr.mxu0 %v1656_v0  ;;  %1455 = vmatprep.subr.mxu1 %v1656_v0 }
 0x119   :  { %v1513_v11 = vpop.eup %1512  ;;  %v1218_v12 = vpop.f32.mrf.mxu0  ;;  %1471 = vmatpush3.msra.mxu1 %v1956_v54 }
 0x11a   :  { %v293_v14 = vmul.f32 0.70710677, %v257_v9  ;;  %1279 = vmatmul.mubr.f32.gmra.mxu1 %v1897_v10  ;;  %v319_v16 = vadd.f32 1.0, %v1513_v11  ;;  %v278_v36 = vmul.f32 0.5, %v257_v9  ;;  %1456 = vmatprep.subr.mxu1 %v1656_v0 }
 0x11b   :  { %v261_v17 = vpop.f32.mrf.mxu0  ;;  %1281 = vmatprep.mubr.msk.f32.mxu1 %vm1657_vm0, %v1656_v0  ;;  %1472 = vmatpush3.msra.mxu1 %v1963_v55 }
 0x11c   :  { %1520 = verf.f32 %v293_v14  ;;  %v262_v18 = vadd.f32 %v1841_v44, %v261_v17  ;;  %v1903_v19 = vmul.f32 %v319_v16, %v274_v13  ;;  %1457 = vmatprep.subr.mxu1 %v1656_v0 }
 0x11d   :  { %v1515_v20 = vpop.eup %1514  ;;  %v1221_v21 = vpop.f32.mrf.mxu0  ;;  %1473 = vmatpush3.msra.mxu1 %v1970_v57 }
 0x11e   :  { %v294_v24 = vmul.f32 0.70710677, %v262_v18  ;;  %1282 = vmatmul.mubr.f32.gmra.mxu1 %v1903_v19  ;;  %v320_v25 = vadd.f32 1.0, %v1515_v20  ;;  %v279_v41 = vmul.f32 0.5, %v262_v18  ;;  %1458 = vmatprep.subr.mxu1 %v1656_v0 }
 0x11f   :  { %1284 = vmatprep.mubr.msk.f32.mxu1 %vm1657_vm0, %v1656_v0  ;;  %1474 = vmatpush3.msra.mxu1 %v1977_v58 }
 0x120   :  { %1522 = verf.f32 %v294_v24  ;;  %v1908_v26 = vmul.f32 %v320_v25, %v275_v22  ;;  %1459 = vmatprep.subr.mxu1 %v1656_v0 }
 0x121   :  { %v1517_v27 = vpop.eup %1516 }
 0x122   :  { %1285 = vmatmul.mubr.f32.gmra.mxu1 %v1908_v26  ;;  %v321_v44 = vadd.f32 1.0, %v1517_v27 }
 0x123   :  { %1287 = vmatprep.mubr.msk.f32.mxu1 %vm1657_vm0, %v1656_v0 }
 0x124   :  { %v1913_v29 = vmul.f32 %v321_v44, %v276_v28 }
 0x125   :  { %v1519_v30 = vpop.eup %1518 }
 0x126   :  { %1288 = vmatmul.mubr.f32.gmra.mxu1 %v1913_v29  ;;  %v322_v33 = vadd.f32 1.0, %v1519_v30 }
 0x127   :  { %1290 = vmatprep.mubr.msk.f32.mxu1 %vm1657_vm0, %v1656_v0 }
 0x128   :  { %v1918_v34 = vmul.f32 %v322_v33, %v277_v32 }
 0x129   :  { %v1521_v35 = vpop.eup %1520 }
 0x12a   :  { %1291 = vmatmul.mubr.f32.gmra.mxu1 %v1918_v34  ;;  %v323_v37 = vadd.f32 1.0, %v1521_v35 }
 0x12b   :  { %1293 = vmatprep.mubr.msk.f32.mxu1 %vm1657_vm0, %v1656_v0 }
 0x12c   :  { %v1923_v38 = vmul.f32 %v323_v37, %v278_v36 }
 0x12d   :  { %v1523_v40 = vpop.eup %1522 }
 0x12e   :  { %1294 = vmatmul.mubr.f32.gmra.mxu1 %v1923_v38  ;;  %v324_v42 = vadd.f32 1.0, %v1523_v40 }
 0x12f   :  { %1296 = vmatprep.mubr.msk.f32.mxu1 %vm1657_vm0, %v1656_v0 }
 0x130   :  { %v1928_v43 = vmul.f32 %v324_v42, %v279_v41 }
 0x132   :  { %1297 = vmatmul.mubr.f32.gmra.mxu1 %v1928_v43 }
 0x133   :  { %1417 = vmatprep.mubr.msk.f32.mxu1 %vm1657_vm0, %v1656_v0 }
 0x1ba   :  { %v429_v60 = vpop.f32.mrf.mxu1 }
 0x1bb   :  { %v430_v61 = vadd.f32 %v1981_v59, %v429_v60 }
 0x1bc   :  { %v1256_v62 = vpop.f32.mrf.mxu1 }
 0x1bd   :  { %v518_v63 = vmul.f32 0.70710677, %v430_v61  ;;  %v503_v22 = vmul.f32 0.5, %v430_v61 }
 0x1be   :  { %v434_v2 = vpop.f32.mrf.mxu1 }
 0x1bf   :  { %1524 = verf.f32 %v518_v63  ;;  %v435_v3 = vadd.f32 %v1981_v59, %v434_v2 }
 0x1c0   :  { %v1259_v4 = vpop.f32.mrf.mxu1 }
 0x1c1   :  { %v519_v5 = vmul.f32 0.70710677, %v435_v3  ;;  %v504_v35 = vmul.f32 0.5, %v435_v3 }
 0x1c2   :  { %v439_v6 = vpop.f32.mrf.mxu1 }
 0x1c3   :  { %1526 = verf.f32 %v519_v5  ;;  %v440_v8 = vadd.f32 %v1981_v59, %v439_v6 }
 0x1c4   :  { %v1262_v9 = vpop.f32.mrf.mxu1 }
 0x1c5   :  { %v520_v11 = vmul.f32 0.70710677, %v440_v8 }
 0x1c6   :  { %v444_v12 = vpop.f32.mrf.mxu1 }
 0x1c7   :  { %1528 = verf.f32 %v520_v11  ;;  %v445_v13 = vadd.f32 %v1981_v59, %v444_v12 }
 0x1c8   :  { %v1265_v14 = vpop.f32.mrf.mxu1 }
 0x1c9   :  { %v521_v16 = vmul.f32 0.70710677, %v445_v13 }
 0x1ca   :  { %v449_v17 = vpop.f32.mrf.mxu1 }
 0x1cb   :  { %1530 = verf.f32 %v521_v16  ;;  %v450_v18 = vadd.f32 %v1981_v59, %v449_v17 }
 0x1cc   :  { %v1525_v20 = vpop.eup %1524  ;;  %v1268_v21 = vpop.f32.mrf.mxu1 }
 0x1cd   :  { %v548_v24 = vadd.f32 1.0, %v1525_v20  ;;  %v522_v25 = vmul.f32 0.70710677, %v450_v18 }
 0x1ce   :  { %v454_v27 = vpop.f32.mrf.mxu1 }
 0x1cf   :  { %v563_v28 = vmul.f32 %v548_v24, %v503_v22  ;;  %1532 = verf.f32 %v522_v25  ;;  %v1989_v44 = vadd.f32 %v1981_v59, %v454_v27 }
 0x1d0   :  { %v1527_v30 = vpop.eup %1526  ;;  %v1271_v32 = vpop.f32.mrf.mxu1 }
 0x1d1   :  { %v1992_v33 = vadd.f32 %v563_v28, %v1849_v7  ;;  %v549_v36 = vadd.f32 1.0, %v1527_v30  ;;  %v523_v37 = vmul.f32 0.70710677, %v1989_v44  ;;  %v505_v7 = vmul.f32 0.5, %v440_v8 }
 0x1d2   :  { %v459_v40 = vpop.f32.mrf.mxu1 }
 0x1d3   :  { %v564_v41 = vmul.f32 %v549_v36, %v504_v35  ;;  %1534 = verf.f32 %v523_v37  ;;  %v1996_v42 = vadd.f32 %v1981_v59, %v459_v40  ;;  %1332 = vmatmul.mubr.f32.vlgmr.msra.gmra.mxu0 %v1992_v33 }
 0x1d4   :  { %v1529_v45 = vpop.eup %1528  ;;  %v1274_v46 = vpop.f32.mrf.mxu1  ;;  %1334 = vmatprep.mubr.msk.f32.mxu0 %vm1657_vm0, %v1656_v0  ;;  %1377 = vmatpush3.msra.mxu0 %v1942_v52 }
 0x1d5   :  { %v550_v47 = vadd.f32 1.0, %v1529_v45  ;;  %v524_v49 = vmul.f32 0.70710677, %v1996_v42  ;;  %v2004_v50 = vadd.f32 %v564_v41, %v1855_v15  ;;  %1378 = vmatprep.subr.mxu0 %v1656_v0  ;;  %v506_v15 = vmul.f32 0.5, %v445_v13 }
 0x1d6   :  { %v464_v51 = vpop.f32.mrf.mxu1  ;;  %1379 = vmatpush3.msra.mxu0 %v1949_v53  ;;  %v509_v25 = vmul.f32 0.5, %v1996_v42 }
 0x1d7   :  { %v565_v60 = vmul.f32 %v550_v47, %v505_v7  ;;  %1536 = verf.f32 %v524_v49  ;;  %v465_v61 = vadd.f32 %v1981_v59, %v464_v51  ;;  %1335 = vmatmul.mubr.f32.gmra.mxu0 %v2004_v50  ;;  %1380 = vmatprep.subr.mxu0 %v1656_v0 }
 0x1d8   :  { %v1531_v52 = vpop.eup %1530  ;;  %v1277_v62 = vpop.f32.mrf.mxu1  ;;  %1337 = vmatprep.mubr.msk.f32.mxu0 %vm1657_vm0, %v1656_v0  ;;  %1381 = vmatpush3.msra.mxu0 %v1956_v54 }
 0x1d9   :  { %v551_v63 = vadd.f32 1.0, %v1531_v52  ;;  %v525_v2 = vmul.f32 0.70710677, %v465_v61  ;;  %v2015_v53 = vadd.f32 %v565_v60, %v1861_v23  ;;  %1382 = vmatprep.subr.mxu0 %v1656_v0  ;;  %v507_v23 = vmul.f32 0.5, %v450_v18 }
 0x1da   :  { %v469_v3 = vpop.f32.mrf.mxu1  ;;  %1383 = vmatpush3.msra.mxu0 %v1963_v55  ;;  %v510_v37 = vmul.f32 0.5, %v465_v61 }
 0x1db   :  { %v566_v4 = vmul.f32 %v551_v63, %v506_v15  ;;  %1538 = verf.f32 %v525_v2  ;;  %v470_v5 = vadd.f32 %v1981_v59, %v469_v3  ;;  %1338 = vmatmul.mubr.f32.gmra.mxu0 %v2015_v53  ;;  %1384 = vmatprep.subr.mxu0 %v1656_v0 }
 0x1dc   :  { %v1533_v54 = vpop.eup %1532  ;;  %v1280_v6 = vpop.f32.mrf.mxu1  ;;  %1340 = vmatprep.mubr.msk.f32.mxu0 %vm1657_vm0, %v1656_v0  ;;  %1385 = vmatpush3.msra.mxu0 %v1970_v57 }
 0x1dd   :  { %v552_v8 = vadd.f32 1.0, %v1533_v54  ;;  %v526_v9 = vmul.f32 0.70710677, %v470_v5  ;;  %v2026_v55 = vadd.f32 %v566_v4, %v1867_v31  ;;  %1386 = vmatprep.subr.mxu0 %v1656_v0  ;;  %v508_v31 = vmul.f32 0.5, %v1989_v44 }
 0x1de   :  { %v474_v11 = vpop.f32.mrf.mxu1  ;;  %1387 = vmatpush3.msra.mxu0 %v1977_v58  ;;  %v511_v49 = vmul.f32 0.5, %v470_v5 }
 0x1df   :  { %v567_v12 = vmul.f32 %v552_v8, %v507_v23  ;;  %1540 = verf.f32 %v526_v9  ;;  %v475_v13 = vadd.f32 %v1981_v59, %v474_v11  ;;  %1341 = vmatmul.mubr.f32.gmra.mxu0 %v2026_v55  ;;  %1388 = vmatprep.subr.mxu0 %v1656_v0 }
 0x1e0   :  { %v1535_v57 = vpop.eup %1534  ;;  %v1283_v14 = vpop.f32.mrf.mxu1  ;;  %1343 = vmatprep.mubr.msk.f32.mxu0 %vm1657_vm0, %v1656_v0 }
 0x1e1   :  { %v553_v16 = vadd.f32 1.0, %v1535_v57  ;;  %v527_v17 = vmul.f32 0.70710677, %v475_v13  ;;  %v2037_v18 = vadd.f32 %v567_v12, %v1873_v39  ;;  %v512_v2 = vmul.f32 0.5, %v475_v13 }
 0x1e2   :  { %v479_v58 = vpop.f32.mrf.mxu1 }
 0x1e3   :  { %v568_v20 = vmul.f32 %v553_v16, %v508_v31  ;;  %1542 = verf.f32 %v527_v17  ;;  %v480_v21 = vadd.f32 %v1981_v59, %v479_v58  ;;  %1344 = vmatmul.mubr.f32.gmra.mxu0 %v2037_v18 }
 0x1e4   :  { %v1537_v22 = vpop.eup %1536  ;;  %v1286_v24 = vpop.f32.mrf.mxu1  ;;  %1346 = vmatprep.mubr.msk.f32.mxu0 %vm1657_vm0, %v1656_v0 }
 0x1e5   :  { %v554_v27 = vadd.f32 1.0, %v1537_v22  ;;  %v528_v28 = vmul.f32 0.70710677, %v480_v21  ;;  %v2045_v44 = vadd.f32 %v568_v20, %v1879_v48  ;;  %v513_v9 = vmul.f32 0.5, %v480_v21 }
 0x1e6   :  { %v484_v39 = vpop.f32.mrf.mxu1 }
 0x1e7   :  { %v569_v30 = vmul.f32 %v554_v27, %v509_v25  ;;  %1544 = verf.f32 %v528_v28  ;;  %v485_v32 = vadd.f32 %v1981_v59, %v484_v39  ;;  %1347 = vmatmul.mubr.f32.gmra.mxu0 %v2045_v44 }
 0x1e8   :  { %v1539_v35 = vpop.eup %1538  ;;  %v1289_v36 = vpop.f32.mrf.mxu1  ;;  %1349 = vmatprep.mubr.msk.f32.mxu0 %vm1657_vm0, %v1656_v0 }
 0x1e9   :  { %v555_v40 = vadd.f32 1.0, %v1539_v35  ;;  %v529_v41 = vmul.f32 0.70710677, %v485_v32  ;;  %v2052_v42 = vadd.f32 %v569_v30, %v1885_v56  ;;  %v857_v35 = vld [vmem:[%s2228_s5 + $0x48] sm:$0xff]  ;;  %v854_v36 = vld [vmem:[%s2228_s5 + $0x30] sm:$0xff] }
 0x1ea   :  { %v489_v48 = vpop.f32.mrf.mxu1  ;;  %1475 = vmatpush3.msra.mxu1 %v857_v35  ;;  %1389 = vmatpush3.msra.mxu0 %v857_v35 }
 0x1eb   :  { %v570_v45 = vmul.f32 %v555_v40, %v510_v37  ;;  %1546 = verf.f32 %v529_v41  ;;  %v490_v46 = vadd.f32 %v1981_v59, %v489_v48  ;;  %1350 = vmatmul.mubr.f32.gmra.mxu0 %v2052_v42  ;;  %1460 = vmatprep.subr.mxu1 %v1656_v0  ;;  %v853_v37 = vld [vmem:[%s2228_s5 + $0x28] sm:$0xff]  ;;  %v852_v40 = vld [vmem:[%s2228_s5 + $0x20] sm:$0xff]  ;;  %v851_v41 = vld [vmem:[%s2228_s5 + $0x18] sm:$0xff] }
 0x1ec   :  { %v1541_v7 = vpop.eup %1540  ;;  %v1292_v47 = vpop.f32.mrf.mxu1  ;;  %1352 = vmatprep.mubr.msk.f32.mxu0 %vm1657_vm0, %v1656_v0  ;;  %1390 = vmatprep.subr.mxu0 %v1656_v0  ;;  %v850_v48 = vld [vmem:[%s2228_s5 + $0x10] sm:$0xff] }
 0x1ed   :  { %v556_v51 = vadd.f32 1.0, %v1541_v7  ;;  %v530_v60 = vmul.f32 0.70710677, %v490_v46  ;;  %v2059_v61 = vadd.f32 %v570_v45, %v1891_v1  ;;  %v849_v45 = vld [vmem:[%s2228_s5 + $0x8] sm:$0xff]  ;;  %v2156_v7 = vld [vmem:[#allocation5 + $0x1] ss:$0 sm:$0xff] }
 0x1ee   :  { %v494_v56 = vpop.f32.mrf.mxu1 }
 0x1ef   :  { %v571_v52 = vmul.f32 %v556_v51, %v511_v49  ;;  %1548 = verf.f32 %v530_v60  ;;  %v495_v62 = vadd.f32 %v1981_v59, %v494_v56  ;;  %1353 = vmatmul.mubr.f32.gmra.mxu0 %v2059_v61 }
 0x1f0   :  { %v1543_v15 = vpop.eup %1542  ;;  %v1295_v63 = vpop.f32.mrf.mxu1  ;;  %1355 = vmatprep.mubr.msk.f32.mxu0 %vm1657_vm0, %v1656_v0 }
 0x1f1   :  { %v557_v3 = vadd.f32 1.0, %v1543_v15  ;;  %v531_v4 = vmul.f32 0.70710677, %v495_v62  ;;  %v2066_v5 = vadd.f32 %v571_v52, %v1897_v10 }
 0x1f2   :  { %v499_v1 = vpop.f32.mrf.mxu1 }
 0x1f3   :  { %v572_v54 = vmul.f32 %v557_v3, %v512_v2  ;;  %1550 = verf.f32 %v531_v4  ;;  %v500_v6 = vadd.f32 %v1981_v59, %v499_v1  ;;  %1356 = vmatmul.mubr.f32.gmra.mxu0 %v2066_v5  ;;  %v514_v59 = vmul.f32 0.5, %v485_v32 }
 0x1f4   :  { %v1545_v23 = vpop.eup %1544  ;;  %v1298_v8 = vpop.f32.mrf.mxu1  ;;  %1358 = vmatprep.mubr.msk.f32.mxu0 %vm1657_vm0, %v1656_v0 }
 0x1f5   :  { %v558_v11 = vadd.f32 1.0, %v1545_v23  ;;  %v532_v12 = vmul.f32 0.70710677, %v500_v6  ;;  %v2073_v13 = vadd.f32 %v572_v54, %v1903_v19  ;;  %v515_v19 = vmul.f32 0.5, %v490_v46  ;;  %v848_v46 = vld [vmem:[%s2228_s5] sm:$0xff] }
 0x1f7   :  { %v573_v10 = vmul.f32 %v558_v11, %v513_v9  ;;  %1552 = verf.f32 %v532_v12  ;;  %1359 = vmatmul.mubr.f32.gmra.mxu0 %v2073_v13 }
 0x1f8   :  { %v1547_v57 = vpop.eup %1546  ;;  %1361 = vmatprep.mubr.msk.f32.mxu0 %vm1657_vm0, %v1656_v0 }
 0x1f9   :  { %v559_v14 = vadd.f32 1.0, %v1547_v57  ;;  %v2079_v31 = vadd.f32 %v573_v10, %v1908_v26  ;;  %v516_v26 = vmul.f32 0.5, %v495_v62 }
 0x1fb   :  { %v574_v16 = vmul.f32 %v559_v14, %v514_v59  ;;  %1362 = vmatmul.mubr.f32.gmra.mxu0 %v2079_v31 }
 0x1fc   :  { %v1549_v17 = vpop.eup %1548  ;;  %1364 = vmatprep.mubr.msk.f32.mxu0 %vm1657_vm0, %v1656_v0 }
 0x1fd   :  { %v560_v58 = vadd.f32 1.0, %v1549_v17  ;;  %v2085_v20 = vadd.f32 %v574_v16, %v1913_v29  ;;  %v517_v29 = vmul.f32 0.5, %v500_v6 }
 0x1ff   :  { %v575_v21 = vmul.f32 %v560_v58, %v515_v19  ;;  %1365 = vmatmul.mubr.f32.gmra.mxu0 %v2085_v20 }
 0x200   :  { %v1551_v22 = vpop.eup %1550  ;;  %1367 = vmatprep.mubr.msk.f32.mxu0 %vm1657_vm0, %v1656_v0 }
 0x201   :  { %v561_v24 = vadd.f32 1.0, %v1551_v22  ;;  %v2091_v25 = vadd.f32 %v575_v21, %v1918_v34 }
 0x203   :  { %v576_v27 = vmul.f32 %v561_v24, %v516_v26  ;;  %1368 = vmatmul.mubr.f32.gmra.mxu0 %v2091_v25 }
 0x204   :  { %v1553_v28 = vpop.eup %1552  ;;  %1370 = vmatprep.mubr.msk.f32.mxu0 %vm1657_vm0, %v1656_v0 }
 0x205   :  { %v562_v39 = vadd.f32 1.0, %v1553_v28  ;;  %v2097_v30 = vadd.f32 %v576_v27, %v1923_v38  ;;  %v856_v38 = vld [vmem:[%s2228_s5 + $0x40] sm:$0xff] }
 0x206   :  { %1476 = vmatpush3.msra.mxu1 %v856_v38  ;;  %1391 = vmatpush3.msra.mxu0 %v856_v38 }
 0x207   :  { %v577_v32 = vmul.f32 %v562_v39, %v517_v29  ;;  %1371 = vmatmul.mubr.f32.gmra.mxu0 %v2097_v30  ;;  %1461 = vmatprep.subr.mxu1 %v1656_v0 }
 0x208   :  { %1373 = vmatprep.mubr.msk.f32.mxu0 %vm1657_vm0, %v1656_v0  ;;  %1392 = vmatprep.subr.mxu0 %v1656_v0 }
 0x209   :  { %v2103_v34 = vadd.f32 %v577_v32, %v1928_v43  ;;  %v855_v43 = vld [vmem:[%s2228_s5 + $0x38] sm:$0xff] }
 0x20a   :  { %1477 = vmatpush3.msra.mxu1 %v855_v43  ;;  %1393 = vmatpush3.msra.mxu0 %v855_v43 }
 0x20b   :  { %1374 = vmatmul.mubr.f32.gmra.mxu0 %v2103_v34  ;;  %1462 = vmatprep.subr.mxu1 %v1656_v0 }
 0x20c   :  { %1408 = vmatprep.mubr.msk.f32.mxu0 %vm1657_vm0, %v1656_v0  ;;  %1394 = vmatprep.subr.mxu0 %v1656_v0 }
 0x20d   :  { %1478 = vmatpush3.msra.mxu1 %v854_v36  ;;  %1395 = vmatpush3.msra.mxu0 %v854_v36 }
 0x20e   :  { %1396 = vmatprep.subr.mxu0 %v1656_v0  ;;  %1463 = vmatprep.subr.mxu1 %v1656_v0 }
 0x20f   :  { %1397 = vmatpush3.msra.mxu0 %v853_v37  ;;  %1479 = vmatpush3.msra.mxu1 %v853_v37 }
 0x210   :  { %1398 = vmatprep.subr.mxu0 %v1656_v0  ;;  %1464 = vmatprep.subr.mxu1 %v1656_v0 }
 0x211   :  { %1399 = vmatpush3.msra.mxu0 %v852_v40  ;;  %1480 = vmatpush3.msra.mxu1 %v852_v40 }
 0x212   :  { %1400 = vmatprep.subr.mxu0 %v1656_v0  ;;  %1465 = vmatprep.subr.mxu1 %v1656_v0 }
 0x213   :  { %1401 = vmatpush3.msra.mxu0 %v851_v41  ;;  %1481 = vmatpush3.msra.mxu1 %v851_v41 }
 0x214   :  { %1402 = vmatprep.subr.mxu0 %v1656_v0  ;;  %1466 = vmatprep.subr.mxu1 %v1656_v0 }
 0x215   :  { %1403 = vmatpush3.msra.mxu0 %v850_v48  ;;  %1482 = vmatpush3.msra.mxu1 %v850_v48 }
 0x216   :  { %1404 = vmatprep.subr.mxu0 %v1656_v0  ;;  %1467 = vmatprep.subr.mxu1 %v1656_v0 }
 0x217   :  { %1405 = vmatpush3.msra.mxu0 %v849_v45  ;;  %1483 = vmatpush3.msra.mxu1 %v849_v45 }
 0x218   :  { %1406 = vmatprep.subr.mxu0 %v1656_v0  ;;  %1468 = vmatprep.subr.mxu1 %v1656_v0 }
 0x219   :  { %1407 = vmatpush3.msra.mxu0 %v848_v46  ;;  %1484 = vmatpush3.msra.mxu1 %v848_v46 }
 0x293   :  { %v684_v47 = vpop.f32.mrf.mxu0 }
 0x294   :  { %v685_v49 = vadd.f32 %v2156_v7, %v684_v47 }
 0x295   :  { %v1333_v51 = vpop.f32.mrf.mxu0 }
 0x296   :  { %v773_v60 = vmul.f32 0.70710677, %v685_v49  ;;  %v758_v10 = vmul.f32 0.5, %v685_v49 }
 0x297   :  { %v689_v56 = vpop.f32.mrf.mxu0 }
 0x298   :  { %1554 = verf.f32 %v773_v60  ;;  %v690_v52 = vadd.f32 %v2156_v7, %v689_v56 }
 0x299   :  { %v1336_v62 = vpop.f32.mrf.mxu0 }
 0x29a   :  { %v774_v15 = vmul.f32 0.70710677, %v690_v52  ;;  %v759_v22 = vmul.f32 0.5, %v690_v52 }
 0x29b   :  { %v694_v63 = vpop.f32.mrf.mxu0 }
 0x29c   :  { %1556 = verf.f32 %v774_v15  ;;  %v695_v2 = vadd.f32 %v2156_v7, %v694_v63 }
 0x29d   :  { %v1339_v3 = vpop.f32.mrf.mxu0 }
 0x29e   :  { %v775_v4 = vmul.f32 0.70710677, %v695_v2  ;;  %v760_v35 = vmul.f32 0.5, %v695_v2 }
 0x29f   :  { %v699_v1 = vpop.f32.mrf.mxu0 }
 0x2a0   :  { %1558 = verf.f32 %v775_v4  ;;  %v700_v54 = vadd.f32 %v2156_v7, %v699_v1 }
 0x2a1   :  { %v1342_v6 = vpop.f32.mrf.mxu0 }
 0x2a2   :  { %v776_v23 = vmul.f32 0.70710677, %v700_v54  ;;  %v761_v45 = vmul.f32 0.5, %v700_v54 }
 0x2a3   :  { %v704_v8 = vpop.f32.mrf.mxu0 }
 0x2a4   :  { %1560 = verf.f32 %v776_v23  ;;  %v705_v9 = vadd.f32 %v2156_v7, %v704_v8 }
 0x2a5   :  { %v1555_v11 = vpop.eup %1554  ;;  %v1345_v12 = vpop.f32.mrf.mxu0 }
 0x2a6   :  { %v803_v57 = vadd.f32 1.0, %v1555_v11  ;;  %v777_v59 = vmul.f32 0.70710677, %v705_v9  ;;  %v762_v15 = vmul.f32 0.5, %v705_v9 }
 0x2a7   :  { %v709_v14 = vpop.f32.mrf.mxu0 }
 0x2a8   :  { %v818_v16 = vmul.f32 %v803_v57, %v758_v10  ;;  %1562 = verf.f32 %v777_v59  ;;  %v710_v17 = vadd.f32 %v2156_v7, %v709_v14 }
 0x2a9   :  { %v1557_v19 = vpop.eup %1556  ;;  %v1348_v58 = vpop.f32.mrf.mxu0 }
 0x2aa   :  { %v833_v21 = vadd.f32 %v818_v16, %v1992_v33  ;;  %v804_v26 = vadd.f32 1.0, %v1557_v19  ;;  %v778_v24 = vmul.f32 0.70710677, %v710_v17  ;;  %v763_v6 = vmul.f32 0.5, %v710_v17 }
 0x2ab   :  { %v714_v27 = vpop.f32.mrf.mxu0 }
 0x2ac   :  { %v819_v28 = vmul.f32 %v804_v26, %v759_v22  ;;  %1564 = verf.f32 %v778_v24  ;;  %v715_v29 = vadd.f32 %v2156_v7, %v714_v27  ;;  %1409 = vmatmul.mubr.f32.vlgmr.msra.gmra.mxu0 %v833_v21 }
 0x2ad   :  { %v1559_v39 = vpop.eup %1558  ;;  %v1351_v32 = vpop.f32.mrf.mxu0  ;;  %1411 = vmatprep.mubr.msk.f32.mxu0 %vm1657_vm0, %v1656_v0 }
 0x2ae   :  { %v805_v38 = vadd.f32 1.0, %v1559_v39  ;;  %v779_v43 = vmul.f32 0.70710677, %v715_v29  ;;  %v834_v36 = vadd.f32 %v819_v28, %v2004_v50  ;;  %v764_v59 = vmul.f32 0.5, %v715_v29 }
 0x2af   :  { %v719_v33 = vpop.f32.mrf.mxu0 }
 0x2b0   :  { %v820_v37 = vmul.f32 %v805_v38, %v760_v35  ;;  %1566 = verf.f32 %v779_v43  ;;  %v720_v40 = vadd.f32 %v2156_v7, %v719_v33  ;;  %1412 = vmatmul.mubr.f32.gmra.mxu0 %v834_v36 }
 0x2b1   :  { %v1561_v41 = vpop.eup %1560  ;;  %v1354_v48 = vpop.f32.mrf.mxu0  ;;  %1414 = vmatprep.mubr.msk.f32.mxu0 %vm1657_vm0, %v1656_v0 }
 0x2b2   :  { %v806_v46 = vadd.f32 1.0, %v1561_v41  ;;  %v780_v47 = vmul.f32 0.70710677, %v720_v40  ;;  %v835_v49 = vadd.f32 %v820_v37, %v2015_v53  ;;  %v765_v26 = vmul.f32 0.5, %v720_v40 }
 0x2b3   :  { %v724_v51 = vpop.f32.mrf.mxu0 }
 0x2b4   :  { %v821_v60 = vmul.f32 %v806_v46, %v761_v45  ;;  %1568 = verf.f32 %v780_v47  ;;  %v725_v50 = vadd.f32 %v2156_v7, %v724_v51  ;;  %1415 = vmatmul.mubr.f32.gmra.mxu0 %v835_v49 }
 0x2b5   :  { %v1563_v56 = vpop.eup %1562  ;;  %v1357_v52 = vpop.f32.mrf.mxu0 }
 0x2b6   :  { %v836_v62 = vadd.f32 %v821_v60, %v2026_v55  ;;  %v807_v63 = vadd.f32 1.0, %v1563_v56  ;;  %v781_v2 = vmul.f32 0.70710677, %v725_v50  ;;  %v766_v38 = vmul.f32 0.5, %v725_v50 }
 0x2b7   :  { %v729_v3 = vpop.f32.mrf.mxu0 }
 0x2b8   :  { %v822_v4 = vmul.f32 %v807_v63, %v762_v15  ;;  %1570 = verf.f32 %v781_v2  ;;  %v730_v1 = vadd.f32 %v2156_v7, %v729_v3  ;;  %1418 = vmatmul.mubr.f32.vlgmr.msra.gmra.mxu1 %v836_v62 }
 0x2b9   :  { %v1565_v53 = vpop.eup %1564  ;;  %v1360_v54 = vpop.f32.mrf.mxu0  ;;  %1420 = vmatprep.mubr.msk.f32.mxu1 %vm1657_vm0, %v1656_v0 }
 0x2ba   :  { %v808_v23 = vadd.f32 1.0, %v1565_v53  ;;  %v782_v8 = vmul.f32 0.70710677, %v730_v1  ;;  %v837_v11 = vadd.f32 %v822_v4, %v2037_v18  ;;  %v767_v45 = vmul.f32 0.5, %v730_v1 }
 0x2bb   :  { %v734_v55 = vpop.f32.mrf.mxu0 }
 0x2bc   :  { %v823_v9 = vmul.f32 %v808_v23, %v763_v6  ;;  %1572 = verf.f32 %v782_v8  ;;  %v735_v12 = vadd.f32 %v2156_v7, %v734_v55  ;;  %1421 = vmatmul.mubr.f32.gmra.mxu1 %v837_v11 }
 0x2bd   :  { %v1567_v10 = vpop.eup %1566  ;;  %v1363_v57 = vpop.f32.mrf.mxu0  ;;  %1423 = vmatprep.mubr.msk.f32.mxu1 %vm1657_vm0, %v1656_v0 }
 0x2be   :  { %v809_v14 = vadd.f32 1.0, %v1567_v10  ;;  %v783_v16 = vmul.f32 0.70710677, %v735_v12  ;;  %v838_v17 = vadd.f32 %v823_v9, %v2045_v44  ;;  %v768_v52 = vmul.f32 0.5, %v735_v12 }
 0x2bf   :  { %v739_v19 = vpop.f32.mrf.mxu0 }
 0x2c0   :  { %v824_v58 = vmul.f32 %v809_v14, %v764_v59  ;;  %1574 = verf.f32 %v783_v16  ;;  %v740_v18 = vadd.f32 %v2156_v7, %v739_v19  ;;  %1424 = vmatmul.mubr.f32.gmra.mxu1 %v838_v17 }
 0x2c1   :  { %v1569_v21 = vpop.eup %1568  ;;  %v1366_v22 = vpop.f32.mrf.mxu0  ;;  %1426 = vmatprep.mubr.msk.f32.mxu1 %vm1657_vm0, %v1656_v0 }
 0x2c2   :  { %v810_v24 = vadd.f32 1.0, %v1569_v21  ;;  %v784_v27 = vmul.f32 0.70710677, %v740_v18  ;;  %v839_v28 = vadd.f32 %v824_v58, %v2052_v42  ;;  %v769_v3 = vmul.f32 0.5, %v740_v18 }
 0x2c3   :  { %v744_v29 = vpop.f32.mrf.mxu0 }
 0x2c4   :  { %v825_v39 = vmul.f32 %v810_v24, %v765_v26  ;;  %1576 = verf.f32 %v784_v27  ;;  %v745_v44 = vadd.f32 %v2156_v7, %v744_v29  ;;  %1427 = vmatmul.mubr.f32.gmra.mxu1 %v839_v28 }
 0x2c5   :  { %v1571_v32 = vpop.eup %1570  ;;  %v1369_v35 = vpop.f32.mrf.mxu0  ;;  %1429 = vmatprep.mubr.msk.f32.mxu1 %vm1657_vm0, %v1656_v0 }
 0x2c6   :  { %v811_v43 = vadd.f32 1.0, %v1571_v32  ;;  %v785_v36 = vmul.f32 0.70710677, %v745_v44  ;;  %v840_v33 = vadd.f32 %v825_v39, %v2059_v61  ;;  %v770_v54 = vmul.f32 0.5, %v745_v44 }
 0x2c7   :  { %v749_v37 = vpop.f32.mrf.mxu0 }
 0x2c8   :  { %v826_v40 = vmul.f32 %v811_v43, %v766_v38  ;;  %1578 = verf.f32 %v785_v36  ;;  %v750_v42 = vadd.f32 %v2156_v7, %v749_v37  ;;  %1430 = vmatmul.mubr.f32.gmra.mxu1 %v840_v33 }
 0x2c9   :  { %v1573_v41 = vpop.eup %1572  ;;  %v1372_v48 = vpop.f32.mrf.mxu0  ;;  %1432 = vmatprep.mubr.msk.f32.mxu1 %vm1657_vm0, %v1656_v0 }
 0x2ca   :  { %v812_v46 = vadd.f32 1.0, %v1573_v41  ;;  %v786_v47 = vmul.f32 0.70710677, %v750_v42  ;;  %v841_v49 = vadd.f32 %v826_v40, %v2066_v5  ;;  %v771_v11 = vmul.f32 0.5, %v750_v42 }
 0x2cb   :  { %v754_v51 = vpop.f32.mrf.mxu0 }
 0x2cc   :  { %v827_v60 = vmul.f32 %v812_v46, %v767_v45  ;;  %1580 = verf.f32 %v786_v47  ;;  %v755_v61 = vadd.f32 %v2156_v7, %v754_v51  ;;  %1433 = vmatmul.mubr.f32.gmra.mxu1 %v841_v49 }
 0x2cd   :  { %v1575_v50 = vpop.eup %1574  ;;  %v1375_v56 = vpop.f32.mrf.mxu0  ;;  %1435 = vmatprep.mubr.msk.f32.mxu1 %vm1657_vm0, %v1656_v0 }
 0x2ce   :  { %v813_v62 = vadd.f32 1.0, %v1575_v50  ;;  %v787_v15 = vmul.f32 0.70710677, %v755_v61  ;;  %v842_v63 = vadd.f32 %v827_v60, %v2073_v13  ;;  %v772_v10 = vmul.f32 0.5, %v755_v61 }
 0x2d0   :  { %v828_v2 = vmul.f32 %v813_v62, %v768_v52  ;;  %1582 = verf.f32 %v787_v15  ;;  %1436 = vmatmul.mubr.f32.gmra.mxu1 %v842_v63 }
 0x2d1   :  { %v1577_v5 = vpop.eup %1576  ;;  %1438 = vmatprep.mubr.msk.f32.mxu1 %vm1657_vm0, %v1656_v0 }
 0x2d2   :  { %v814_v7 = vadd.f32 1.0, %v1577_v5  ;;  %v843_v4 = vadd.f32 %v828_v2, %v2079_v31 }
 0x2d4   :  { %v829_v1 = vmul.f32 %v814_v7, %v769_v3  ;;  %1439 = vmatmul.mubr.f32.gmra.mxu1 %v843_v4 }
 0x2d5   :  { %v1579_v53 = vpop.eup %1578  ;;  %1441 = vmatprep.mubr.msk.f32.mxu1 %vm1657_vm0, %v1656_v0 }
 0x2d6   :  { %v815_v6 = vadd.f32 1.0, %v1579_v53  ;;  %v844_v13 = vadd.f32 %v829_v1, %v2085_v20 }
 0x2d8   :  { %v830_v23 = vmul.f32 %v815_v6, %v770_v54  ;;  %1442 = vmatmul.mubr.f32.gmra.mxu1 %v844_v13 }
 0x2d9   :  { %v1581_v8 = vpop.eup %1580  ;;  %1444 = vmatprep.mubr.msk.f32.mxu1 %vm1657_vm0, %v1656_v0 }
 0x2da   :  { %v816_v55 = vadd.f32 1.0, %v1581_v8  ;;  %v845_v31 = vadd.f32 %v830_v23, %v2091_v25  ;;  %v1062_v25 = vld [vmem:[%s2229_s6] ss:$0 sm:$0xff]  ;;  %s1658_s6 = smov [#allocation7]  }
 0x2db   :  { %s1031_s8 = sshll.u32 %s1658_s6, 4  ;;  %s1032_s8 = int_to_ptr.vmem [resolvable:$true] %s1031_s8 }
 0x2dc   :  { %v831_v9 = vmul.f32 %v816_v55, %v771_v11  ;;  %1445 = vmatmul.mubr.f32.gmra.mxu1 %v845_v31  ;;  %s1624_s9 = scalar_lea.vmem %s1032_s8, 1920  ;;  %p1629_p11 = scmp.lt.s32.totalorder %s1032_s8, %s1032_s8 }
 0x2dd   :  { %v1583_v12 = vpop.eup %1582  ;;  %1447 = vmatprep.mubr.msk.f32.mxu1 %vm1657_vm0, %v1656_v0  ;;  %p1625_p10 = scmp.ne.s32.totalorder %s1032_s8, %s1624_s9  ;;  %p1630_p12 = scmp.lt.s32.totalorder %s1624_s9, %s1624_s9 }
 0x2de   :  { %v817_v57 = vadd.f32 1.0, %v1583_v12  ;;  %v846_v20 = vadd.f32 %v831_v9, %v2097_v30 }
 0x2df   :  { %p1631_p13 = por %p1630_p12, %p1629_p11 }
 0x2e0   :  { %v832_v59 = vmul.f32 %v817_v57, %v772_v10  ;;  %1448 = vmatmul.mubr.f32.gmra.mxu1 %v846_v20 }
 0x2e1   :  { %1450 = vmatprep.mubr.msk.f32.mxu1 %vm1657_vm0, %v1656_v0  ;;  %p1632_p0 = pnand %p1631_p13, %p1625_p10 }
 0x2e2   :  { %v847_v14 = vadd.f32 %v832_v59, %v2103_v34 }
 0x2e4   :  { %1451 = vmatmul.mubr.f32.gmra.mxu1 %v847_v14 }
 0x36c   :  { %v937_v16 = vpop.f32.mrf.mxu0 }
 0x36d   :  { %v938_v17 = vadd.f32 %v1062_v25, %v937_v16 }
 0x36e   :  { %v1410_v19 = vpop.f32.mrf.mxu0 }
 0x36f   :  { %1011 = vst [vmem:[#allocation7] sm:$0xff] %v938_v17 }
 0x370   :  { %v942_v58 = vpop.f32.mrf.mxu0 }
 0x371   :  { %v943_v18 = vadd.f32 %v1062_v25, %v942_v58 }
 0x372   :  { %v1413_v21 = vpop.f32.mrf.mxu0 }
 0x373   :  { %1012 = vst [vmem:[#allocation7 + $0x8] sm:$0xff] %v943_v18 }
 0x374   :  { %v947_v30 = vpop.f32.mrf.mxu0 }
 0x375   :  { %v948_v22 = vadd.f32 %v1062_v25, %v947_v30 }
 0x376   :  { %v1416_v26 = vpop.f32.mrf.mxu0 }
 0x377   :  { %1013 = vst [vmem:[#allocation7 + $0x10] sm:$0xff] %v948_v22 }
 0x378   :  { %v952_v0 = vpop.f32.mrf.mxu1 }
 0x379   :  { %v953_v24 = vadd.f32 %v1062_v25, %v952_v0 }
 0x37a   :  { %v1419_v34 = vpop.f32.mrf.mxu1 }
 0x37b   :  { %1014 = vst [vmem:[#allocation7 + $0x18] sm:$0xff] %v953_v24 }
 0x37c   :  { %v957_v27 = vpop.f32.mrf.mxu1 }
 0x37d   :  { %v958_v28 = vadd.f32 %v1062_v25, %v957_v27 }
 0x37e   :  { %v1422_v29 = vpop.f32.mrf.mxu1 }
 0x37f   :  { %1015 = vst [vmem:[#allocation7 + $0x20] sm:$0xff] %v958_v28 }
 0x380   :  { %v962_v39 = vpop.f32.mrf.mxu1 }
 0x381   :  { %v963_v44 = vadd.f32 %v1062_v25, %v962_v39 }
 0x382   :  { %v1425_v32 = vpop.f32.mrf.mxu1 }
 0x383   :  { %1016 = vst [vmem:[#allocation7 + $0x28] sm:$0xff] %v963_v44 }
 0x384   :  { %v967_v35 = vpop.f32.mrf.mxu1 }
 0x385   :  { %v968_v38 = vadd.f32 %v1062_v25, %v967_v35 }
 0x386   :  { %v1428_v43 = vpop.f32.mrf.mxu1 }
 0x387   :  { %1017 = vst [vmem:[#allocation7 + $0x30] sm:$0xff] %v968_v38 }
 0x388   :  { %v972_v36 = vpop.f32.mrf.mxu1 }
 0x389   :  { %v973_v33 = vadd.f32 %v1062_v25, %v972_v36 }
 0x38a   :  { %v1431_v37 = vpop.f32.mrf.mxu1 }
 0x38b   :  { %1018 = vst [vmem:[#allocation7 + $0x38] sm:$0xff] %v973_v33 }
 0x38c   :  { %v977_v40 = vpop.f32.mrf.mxu1 }
 0x38d   :  { %v978_v42 = vadd.f32 %v1062_v25, %v977_v40 }
 0x38e   :  { %v1434_v41 = vpop.f32.mrf.mxu1 }
 0x38f   :  { %1019 = vst [vmem:[#allocation7 + $0x40] sm:$0xff] %v978_v42 }
 0x390   :  { %v982_v48 = vpop.f32.mrf.mxu1 }
 0x391   :  { %v983_v45 = vadd.f32 %v1062_v25, %v982_v48 }
 0x392   :  { %v1437_v46 = vpop.f32.mrf.mxu1 }
 0x393   :  { %1020 = vst [vmem:[#allocation7 + $0x48] sm:$0xff] %v983_v45 }
 0x394   :  { %v987_v47 = vpop.f32.mrf.mxu1 }
 0x395   :  { %v988_v49 = vadd.f32 %v1062_v25, %v987_v47 }
 0x396   :  { %v1440_v51 = vpop.f32.mrf.mxu1 }
 0x397   :  { %1021 = vst [vmem:[#allocation7 + $0x50] sm:$0xff] %v988_v49 }
 0x398   :  { %v992_v60 = vpop.f32.mrf.mxu1 }
 0x399   :  { %v993_v61 = vadd.f32 %v1062_v25, %v992_v60 }
 0x39a   :  { %v1443_v50 = vpop.f32.mrf.mxu1 }
 0x39b   :  { %1022 = vst [vmem:[#allocation7 + $0x58] sm:$0xff] %v993_v61 }
 0x39c   :  { %v997_v56 = vpop.f32.mrf.mxu1 }
 0x39d   :  { %v998_v52 = vadd.f32 %v1062_v25, %v997_v56 }
 0x39e   :  { %v1446_v62 = vpop.f32.mrf.mxu1 }
 0x39f   :  { %1023 = vst [vmem:[#allocation7 + $0x60] sm:$0xff] %v998_v52 }
 0x3a0   :  { %v1002_v15 = vpop.f32.mrf.mxu1 }
 0x3a1   :  { %v1003_v63 = vadd.f32 %v1062_v25, %v1002_v15 }
 0x3a2   :  { %v1449_v2 = vpop.f32.mrf.mxu1 }
 0x3a3   :  { %1024 = vst [vmem:[#allocation7 + $0x68] sm:$0xff] %v1003_v63 }
 0x3a4   :  { %v1007_v5 = vpop.f32.mrf.mxu1 }
 0x3a5   :  { %v1008_v3 = vadd.f32 %v1062_v25, %v1007_v5 }
 0x3a6   :  { %v1452_v7 = vpop.f32.mrf.mxu1 }
 0x3a7   :  { %1025 = vst [vmem:[#allocation7 + $0x70] sm:$0xff] %v1008_v3 }
 0x3a8   :  { %1635 = shalt.err (!%p1632_p0)
}
 0x3a9   :  { %1037 = dma.vmem_to_hbm [thread:$0]  %s1032_s8, 1920, %s2230_s7, [#allocation4], %s1651_s27, %s1651_s27, %s1652_s28  }
 0x3aa   :  { %1648 = dma.done.wait [#allocation4], 1920  }
 0x3ab   :  { %1649 = vsyncadd [#allocation4], 4294965376 }
 0x3ac   :  { %1041 = vsyncpa [#allocation3], 1 }
 0x3ad   :  { %1042 = vsyncpa [#allocation6], 1 }
 0x3ae   :  { %1043 = vsyncpa [#allocation4], 1 }

// kernel: tpu_custom_call.1
= control target key start
LH: loop header
LB: loop body
LE: loop exit
PB: predicated region body
PF: predicated region fallthrough
CT: control target
= control target key end

     0   :  { %12 = vsyncpa [#allocation3], 0  ;;  %s2223_s0 = inlined_call_operand.vmem [shape: f32[120,16], index: 0, kind: input, shape index: {}]   ;;  %s2224_s1 = inlined_call_operand.vmem [shape: f32[16,128], index: 1, kind: input, shape index: {}]   ;;  %s2225_s2 = inlined_call_operand.vmem [shape: f32[1,128], index: 2, kind: input, shape index: {}]   ;;  %s2226_s3 = inlined_call_operand.hbm [shape: f32[2,128,128], index: 3, kind: input, shape index: {}]   ;;  %s2227_s4 = inlined_call_operand.hbm [shape: f32[2,1,128], index: 4, kind: input, shape index: {}]   ;;  %s2228_s5 = inlined_call_operand.vmem [shape: f32[128,128], index: 5, kind: input, shape index: {}]   ;;  %s2229_s6 = inlined_call_operand.vmem [shape: f32[1,128], index: 6, kind: input, shape index: {}]   ;;  %s2230_s7 = inlined_call_operand.hbm [shape: f32[120,128], index: 7, kind: output, shape index: {}]  }
   0x1   :  { %13 = vsyncpa [#allocation6], 0 }
   0x2   :  { %14 = vsyncpa [#allocation4], 0  ;;  %s1650_s24 = smov [#allocation2]  }
   0x3   :  { %s26_s25 = sshll.u32 %s1650_s24, 4  ;;  %s27_s25 = int_to_ptr.vmem [resolvable:$true] %s26_s25 }
   0x4   :  { %s1592_s26 = scalar_lea.vmem %s27_s25, 4096  ;;  %p1597_p1 = scmp.lt.s32.totalorder %s27_s25, %s27_s25 }
   0x5   :  { %p1593_p0 = scmp.ne.s32.totalorder %s27_s25, %s1592_s26  ;;  %p1598_p2 = scmp.lt.s32.totalorder %s1592_s26, %s1592_s26 }
   0x7   :  { %p1599_p3 = por %p1598_p2, %p1597_p1 }
   0x9   :  { %p1600_p4 = pnand %p1599_p3, %p1593_p0 }
   0xb   :  { %1603 = shalt.err (!%p1600_p4)
}
   0xc   :  { %s1651_s27 = smov 128   ;;  %s1652_s28 = smov 8  }
   0xd   :  { %32 = dma.hbm_to_vmem [thread:$0]  %s2226_s3, 4096, %s27_s25, [#allocation3], %s1651_s27, %s1651_s27, %s1652_s28  }
   0xe   :  { %s1653_s8 = smov [#allocation5]  }
   0xf   :  { %s38_s9 = sshll.u32 %s1653_s8, 4  ;;  %s39_s9 = int_to_ptr.vmem [resolvable:$true] %s38_s9 }
  0x10   :  { %s1612_s10 = scalar_lea.vmem %s39_s9, 32  ;;  %p1617_p6 = scmp.lt.s32.totalorder %s39_s9, %s39_s9 }
  0x11   :  { %p1613_p5 = scmp.ne.s32.totalorder %s39_s9, %s1612_s10  ;;  %p1618_p7 = scmp.lt.s32.totalorder %s1612_s10, %s1612_s10 }
  0x13   :  { %p1619_p8 = por %p1618_p7, %p1617_p6 }
  0x15   :  { %p1620_p9 = pnand %p1619_p8, %p1613_p5 }
  0x17   :  { %1623 = shalt.err (!%p1620_p9)
}
  0x18   :  { %s1654_s11 = smov 16   ;;  %s1655_s12 = smov 1  }
  0x19   :  { %44 = dma.hbm_to_vmem [thread:$0]  %s2227_s4, 32, %s39_s9, [#allocation6], %s1654_s11, %s1654_s11, %s1655_s12  }
  0x1a   :  { %1644 = dma.done.wait [#allocation3], 4096  }
  0x1b   :  { %1645 = vsyncadd [#allocation3], 4294963200 }
  0x1c   :  { %1646 = dma.done.wait [#allocation6], 32  }
  0x1d   :  { %1647 = vsyncadd [#allocation6], 4294967264  ;;  %v1656_v0 = vmov 0.0   ;;  %vm1657_vm0 = vmmov 0   ;;  %v71_v1 = vld [vmem:[%s2224_s1 + $0x8] sm:$0xff]  ;;  %v70_v2 = vld [vmem:[%s2224_s1] sm:$0xff] }
  0x1e   :  { %1173 = vmatprep.subr.mxu0 %v1656_v0  ;;  %1177 = vmatprep.mubr.msk.f32.mxu0 %vm1657_vm0, %v1656_v0  ;;  %v55_v3 = vld [vmem:[%s2223_s0] sm:$0xff]  ;;  %vm79_vm1 = vcmask 130048   ;;  %v56_v4 = vld [vmem:[%s2223_s0 + $0x8] sm:$0xff]  ;;  %v355_v5 = vld [vmem:[#allocation2 + $0x78] sm:$0xff] }
  0x1f   :  { %1222 = vmatprep.subr.mxu1 %v1656_v0  ;;  %1254 = vmatprep.mubr.msk.f32.mxu1 %vm1657_vm0, %v1656_v0  ;;  %v354_v6 = vld [vmem:[#allocation2 + $0x70] sm:$0xff]  ;;  %v353_v7 = vld [vmem:[#allocation2 + $0x68] sm:$0xff]  ;;  %v352_v9 = vld [vmem:[#allocation2 + $0x60] sm:$0xff] }
  0x20   :  { %1174 = vmatpush3.msra.mxu0 %v71_v1  ;;  %1223 = vmatpush3.msra.mxu1 %v355_v5  ;;  %v57_v8 = vld [vmem:[%s2223_s0 + $0x10] sm:$0xff]  ;;  %v58_v10 = vld [vmem:[%s2223_s0 + $0x18] sm:$0xff]  ;;  %v59_v11 = vld [vmem:[%s2223_s0 + $0x20] sm:$0xff] }
  0x21   :  { %1175 = vmatprep.subr.mxu0 %v1656_v0  ;;  %1224 = vmatprep.subr.mxu1 %v1656_v0  ;;  %v60_v12 = vld [vmem:[%s2223_s0 + $0x28] sm:$0xff]  ;;  %v61_v13 = vld [vmem:[%s2223_s0 + $0x30] sm:$0xff]  ;;  %v62_v14 = vld [vmem:[%s2223_s0 + $0x38] sm:$0xff] }
  0x22   :  { %1176 = vmatpush3.msra.mxu0 %v70_v2  ;;  %1225 = vmatpush3.msra.mxu1 %v354_v6  ;;  %v63_v15 = vld [vmem:[%s2223_s0 + $0x40] sm:$0xff]  ;;  %v64_v16 = vld [vmem:[%s2223_s0 + $0x48] sm:$0xff]  ;;  %v65_v17 = vld [vmem:[%s2223_s0 + $0x50] sm:$0xff] }
  0x23   :  { %1178 = vmatmul.mubr.msk.f32.vlgmr.msra.gmra.mxu0 %vm79_vm1, %v55_v3  ;;  %1299 = vmatprep.subr.mxu0 %v1656_v0  ;;  %v66_v18 = vld [vmem:[%s2223_s0 + $0x58] sm:$0xff]  ;;  %v67_v19 = vld [vmem:[%s2223_s0 + $0x60] sm:$0xff]  ;;  %v68_v20 = vld [vmem:[%s2223_s0 + $0x68] sm:$0xff] }
  0x24   :  { %1180 = vmatprep.mubr.msk.f32.mxu0 %vm1657_vm0, %v1656_v0  ;;  %1226 = vmatprep.subr.mxu1 %v1656_v0  ;;  %v69_v21 = vld [vmem:[%s2223_s0 + $0x70] sm:$0xff]  ;;  %v351_v22 = vld [vmem:[#allocation2 + $0x58] sm:$0xff]  ;;  %v349_v24 = vld [vmem:[#allocation2 + $0x48] sm:$0xff] }
  0x25   :  { %1227 = vmatpush3.msra.mxu1 %v353_v7  ;;  %v350_v23 = vld [vmem:[#allocation2 + $0x50] sm:$0xff]  ;;  %v348_v25 = vld [vmem:[#allocation2 + $0x40] sm:$0xff]  ;;  %v347_v26 = vld [vmem:[#allocation2 + $0x38] sm:$0xff] }
  0x26   :  { %1228 = vmatprep.subr.mxu1 %v1656_v0  ;;  %v346_v27 = vld [vmem:[#allocation2 + $0x30] sm:$0xff]  ;;  %v345_v28 = vld [vmem:[#allocation2 + $0x28] sm:$0xff]  ;;  %v344_v29 = vld [vmem:[#allocation2 + $0x20] sm:$0xff] }
  0x27   :  { %1181 = vmatmul.mubr.msk.f32.gmra.mxu0 %vm79_vm1, %v56_v4  ;;  %1229 = vmatpush3.msra.mxu1 %v352_v9  ;;  %v343_v30 = vld [vmem:[#allocation2 + $0x18] sm:$0xff]  ;;  %v342_v31 = vld [vmem:[#allocation2 + $0x10] sm:$0xff]  ;;  %v341_v32 = vld [vmem:[#allocation2 + $0x8] sm:$0xff] }
  0x28   :  { %1183 = vmatprep.mubr.msk.f32.mxu0 %vm1657_vm0, %v1656_v0  ;;  %1230 = vmatprep.subr.mxu1 %v1656_v0  ;;  %v340_v33 = vld [vmem:[#allocation2] sm:$0xff]  ;;  %v609_v34 = vld [vmem:[#allocation2 + $0xf8] sm:$0xff]  ;;  %v608_v35 = vld [vmem:[#allocation2 + $0xf0] sm:$0xff] }
  0x29   :  { %1231 = vmatpush3.msra.mxu1 %v351_v22  ;;  %1300 = vmatpush3.msra.mxu0 %v609_v34  ;;  %v607_v36 = vld [vmem:[#allocation2 + $0xe8] sm:$0xff]  ;;  %v606_v37 = vld [vmem:[#allocation2 + $0xe0] sm:$0xff]  ;;  %v605_v38 = vld [vmem:[#allocation2 + $0xd8] sm:$0xff] }
  0x2a   :  { %1232 = vmatprep.subr.mxu1 %v1656_v0  ;;  %1301 = vmatprep.subr.mxu0 %v1656_v0  ;;  %v604_v39 = vld [vmem:[#allocation2 + $0xd0] sm:$0xff]  ;;  %v603_v40 = vld [vmem:[#allocation2 + $0xc8] sm:$0xff]  ;;  %v602_v41 = vld [vmem:[#allocation2 + $0xc0] sm:$0xff] }
  0x2b   :  { %1184 = vmatmul.mubr.msk.f32.gmra.mxu0 %vm79_vm1, %v57_v8  ;;  %1233 = vmatpush3.msra.mxu1 %v350_v23  ;;  %v601_v42 = vld [vmem:[#allocation2 + $0xb8] sm:$0xff]  ;;  %v600_v43 = vld [vmem:[#allocation2 + $0xb0] sm:$0xff]  ;;  %v1841_v44 = vld [vmem:[%s2225_s2] ss:$0 sm:$0xff] }
  0x2c   :  { %1186 = vmatprep.mubr.msk.f32.mxu0 %vm1657_vm0, %v1656_v0  ;;  %1234 = vmatprep.subr.mxu1 %v1656_v0 }
  0x2d   :  { %1235 = vmatpush3.msra.mxu1 %v349_v24  ;;  %1302 = vmatpush3.msra.mxu0 %v608_v35 }
  0x2e   :  { %1236 = vmatprep.subr.mxu1 %v1656_v0  ;;  %1303 = vmatprep.subr.mxu0 %v1656_v0 }
  0x2f   :  { %1187 = vmatmul.mubr.msk.f32.gmra.mxu0 %vm79_vm1, %v58_v10  ;;  %1237 = vmatpush3.msra.mxu1 %v348_v25 }
  0x30   :  { %1189 = vmatprep.mubr.msk.f32.mxu0 %vm1657_vm0, %v1656_v0  ;;  %1238 = vmatprep.subr.mxu1 %v1656_v0 }
  0x31   :  { %1239 = vmatpush3.msra.mxu1 %v347_v26  ;;  %1304 = vmatpush3.msra.mxu0 %v607_v36 }
  0x32   :  { %1240 = vmatprep.subr.mxu1 %v1656_v0  ;;  %1305 = vmatprep.subr.mxu0 %v1656_v0 }
  0x33   :  { %1190 = vmatmul.mubr.msk.f32.gmra.mxu0 %vm79_vm1, %v59_v11  ;;  %1241 = vmatpush3.msra.mxu1 %v346_v27 }
  0x34   :  { %1192 = vmatprep.mubr.msk.f32.mxu0 %vm1657_vm0, %v1656_v0  ;;  %1242 = vmatprep.subr.mxu1 %v1656_v0 }
  0x35   :  { %1243 = vmatpush3.msra.mxu1 %v345_v28  ;;  %1306 = vmatpush3.msra.mxu0 %v606_v37 }
  0x36   :  { %1244 = vmatprep.subr.mxu1 %v1656_v0  ;;  %1307 = vmatprep.subr.mxu0 %v1656_v0 }
  0x37   :  { %1193 = vmatmul.mubr.msk.f32.gmra.mxu0 %vm79_vm1, %v60_v12  ;;  %1245 = vmatpush3.msra.mxu1 %v344_v29 }
  0x38   :  { %1195 = vmatprep.mubr.msk.f32.mxu0 %vm1657_vm0, %v1656_v0  ;;  %1246 = vmatprep.subr.mxu1 %v1656_v0 }
  0x39   :  { %1247 = vmatpush3.msra.mxu1 %v343_v30  ;;  %1308 = vmatpush3.msra.mxu0 %v605_v38 }
  0x3a   :  { %1248 = vmatprep.subr.mxu1 %v1656_v0  ;;  %1309 = vmatprep.subr.mxu0 %v1656_v0 }
  0x3b   :  { %1196 = vmatmul.mubr.msk.f32.gmra.mxu0 %vm79_vm1, %v61_v13  ;;  %1249 = vmatpush3.msra.mxu1 %v342_v31 }
  0x3c   :  { %1198 = vmatprep.mubr.msk.f32.mxu0 %vm1657_vm0, %v1656_v0  ;;  %1250 = vmatprep.subr.mxu1 %v1656_v0 }
  0x3d   :  { %1251 = vmatpush3.msra.mxu1 %v341_v32  ;;  %1310 = vmatpush3.msra.mxu0 %v604_v39 }
  0x3e   :  { %1252 = vmatprep.subr.mxu1 %v1656_v0  ;;  %1311 = vmatprep.subr.mxu0 %v1656_v0 }
  0x3f   :  { %1199 = vmatmul.mubr.msk.f32.gmra.mxu0 %vm79_vm1, %v62_v14  ;;  %1253 = vmatpush3.msra.mxu1 %v340_v33 }
  0x40   :  { %1201 = vmatprep.mubr.msk.f32.mxu0 %vm1657_vm0, %v1656_v0  ;;  %1453 = vmatprep.subr.mxu1 %v1656_v0 }
  0x41   :  { %1312 = vmatpush3.msra.mxu0 %v603_v40 }
  0x42   :  { %1313 = vmatprep.subr.mxu0 %v1656_v0 }
  0x43   :  { %1202 = vmatmul.mubr.msk.f32.gmra.mxu0 %vm79_vm1, %v63_v15 }
  0x44   :  { %1204 = vmatprep.mubr.msk.f32.mxu0 %vm1657_vm0, %v1656_v0  ;;  %1314 = vmatpush3.msra.mxu0 %v602_v41 }
  0x45   :  { %1315 = vmatprep.subr.mxu0 %v1656_v0 }
  0x46   :  { %1316 = vmatpush3.msra.mxu0 %v601_v42 }
  0x47   :  { %1205 = vmatmul.mubr.msk.f32.gmra.mxu0 %vm79_vm1, %v64_v16  ;;  %1317 = vmatprep.subr.mxu0 %v1656_v0 }
  0x48   :  { %1207 = vmatprep.mubr.msk.f32.mxu0 %vm1657_vm0, %v1656_v0  ;;  %1318 = vmatpush3.msra.mxu0 %v600_v43 }
  0x49   :  { %1319 = vmatprep.subr.mxu0 %v1656_v0 }
  0x4b   :  { %1208 = vmatmul.mubr.msk.f32.gmra.mxu0 %vm79_vm1, %v65_v17 }
  0x4c   :  { %1210 = vmatprep.mubr.msk.f32.mxu0 %vm1657_vm0, %v1656_v0 }
  0x4f   :  { %1211 = vmatmul.mubr.msk.f32.gmra.mxu0 %vm79_vm1, %v66_v18 }
  0x50   :  { %1213 = vmatprep.mubr.msk.f32.mxu0 %vm1657_vm0, %v1656_v0 }
  0x53   :  { %1214 = vmatmul.mubr.msk.f32.gmra.mxu0 %vm79_vm1, %v67_v19 }
  0x54   :  { %1216 = vmatprep.mubr.msk.f32.mxu0 %vm1657_vm0, %v1656_v0 }
  0x57   :  { %1217 = vmatmul.mubr.msk.f32.gmra.mxu0 %vm79_vm1, %v68_v20 }
  0x58   :  { %1219 = vmatprep.mubr.msk.f32.mxu0 %vm1657_vm0, %v1656_v0 }
  0x5b   :  { %1220 = vmatmul.mubr.msk.f32.gmra.mxu0 %vm79_vm1, %v69_v21 }
  0x5c   :  { %1331 = vmatprep.mubr.msk.f32.mxu0 %vm1657_vm0, %v1656_v0 }
  0xe3   :  { %v191_v45 = vpop.f32.mrf.mxu0 }
  0xe4   :  { %v192_v46 = vadd.f32 %v1841_v44, %v191_v45 }
  0xe5   :  { %v1179_v47 = vpop.f32.mrf.mxu0 }
  0xe6   :  { %v280_v48 = vmul.f32 0.70710677, %v192_v46  ;;  %v265_v2 = vmul.f32 0.5, %v192_v46 }
  0xe7   :  { %v196_v49 = vpop.f32.mrf.mxu0 }
  0xe8   :  { %1494 = verf.f32 %v280_v48  ;;  %v197_v50 = vadd.f32 %v1841_v44, %v196_v49 }
  0xe9   :  { %v1182_v51 = vpop.f32.mrf.mxu0 }
  0xea   :  { %v281_v52 = vmul.f32 0.70710677, %v197_v50  ;;  %v266_v10 = vmul.f32 0.5, %v197_v50 }
  0xeb   :  { %v201_v53 = vpop.f32.mrf.mxu0 }
  0xec   :  { %1496 = verf.f32 %v281_v52  ;;  %v202_v54 = vadd.f32 %v1841_v44, %v201_v53 }
  0xed   :  { %v1185_v55 = vpop.f32.mrf.mxu0 }
  0xee   :  { %v282_v56 = vmul.f32 0.70710677, %v202_v54  ;;  %v267_v18 = vmul.f32 0.5, %v202_v54 }
  0xef   :  { %v206_v57 = vpop.f32.mrf.mxu0 }
  0xf0   :  { %1498 = verf.f32 %v282_v56  ;;  %v207_v58 = vadd.f32 %v1841_v44, %v206_v57 }
  0xf1   :  { %v1188_v59 = vpop.f32.mrf.mxu0 }
  0xf2   :  { %v283_v60 = vmul.f32 0.70710677, %v207_v58  ;;  %v268_v26 = vmul.f32 0.5, %v207_v58 }
  0xf3   :  { %v211_v61 = vpop.f32.mrf.mxu0 }
  0xf4   :  { %1500 = verf.f32 %v283_v60  ;;  %v212_v62 = vadd.f32 %v1841_v44, %v211_v61 }
  0xf5   :  { %v1495_v63 = vpop.eup %1494  ;;  %v1191_v1 = vpop.f32.mrf.mxu0 }
  0xf6   :  { %v284_v3 = vmul.f32 0.70710677, %v212_v62  ;;  %v310_v4 = vadd.f32 1.0, %v1495_v63  ;;  %v269_v34 = vmul.f32 0.5, %v212_v62 }
  0xf7   :  { %v216_v5 = vpop.f32.mrf.mxu0 }
  0xf8   :  { %1502 = verf.f32 %v284_v3  ;;  %v217_v6 = vadd.f32 %v1841_v44, %v216_v5  ;;  %v1849_v7 = vmul.f32 %v310_v4, %v265_v2 }
  0xf9   :  { %v1497_v8 = vpop.eup %1496  ;;  %v1194_v9 = vpop.f32.mrf.mxu0 }
  0xfa   :  { %v285_v11 = vmul.f32 0.70710677, %v217_v6  ;;  %1255 = vmatmul.mubr.f32.vlgmr.msra.gmra.mxu1 %v1849_v7  ;;  %v311_v12 = vadd.f32 1.0, %v1497_v8  ;;  %v270_v42 = vmul.f32 0.5, %v217_v6 }
  0xfb   :  { %v221_v13 = vpop.f32.mrf.mxu0  ;;  %1257 = vmatprep.mubr.msk.f32.mxu1 %vm1657_vm0, %v1656_v0 }
  0xfc   :  { %1504 = verf.f32 %v285_v11  ;;  %v222_v14 = vadd.f32 %v1841_v44, %v221_v13  ;;  %v1855_v15 = vmul.f32 %v311_v12, %v266_v10 }
  0xfd   :  { %v1499_v16 = vpop.eup %1498  ;;  %v1197_v17 = vpop.f32.mrf.mxu0 }
  0xfe   :  { %v286_v19 = vmul.f32 0.70710677, %v222_v14  ;;  %1258 = vmatmul.mubr.f32.gmra.mxu1 %v1855_v15  ;;  %v312_v20 = vadd.f32 1.0, %v1499_v16  ;;  %v271_v51 = vmul.f32 0.5, %v222_v14 }
  0xff   :  { %v226_v21 = vpop.f32.mrf.mxu0  ;;  %1260 = vmatprep.mubr.msk.f32.mxu1 %vm1657_vm0, %v1656_v0 }
 0x100   :  { %1506 = verf.f32 %v286_v19  ;;  %v227_v22 = vadd.f32 %v1841_v44, %v226_v21  ;;  %v1861_v23 = vmul.f32 %v312_v20, %v267_v18 }
 0x101   :  { %v1501_v24 = vpop.eup %1500  ;;  %v1200_v25 = vpop.f32.mrf.mxu0 }
 0x102   :  { %v287_v27 = vmul.f32 0.70710677, %v227_v22  ;;  %1261 = vmatmul.mubr.f32.gmra.mxu1 %v1861_v23  ;;  %v313_v28 = vadd.f32 1.0, %v1501_v24  ;;  %v272_v59 = vmul.f32 0.5, %v227_v22 }
 0x103   :  { %v231_v29 = vpop.f32.mrf.mxu0  ;;  %1263 = vmatprep.mubr.msk.f32.mxu1 %vm1657_vm0, %v1656_v0 }
 0x104   :  { %1508 = verf.f32 %v287_v27  ;;  %v232_v30 = vadd.f32 %v1841_v44, %v231_v29  ;;  %v1867_v31 = vmul.f32 %v313_v28, %v268_v26 }
 0x105   :  { %v1503_v32 = vpop.eup %1502  ;;  %v1203_v33 = vpop.f32.mrf.mxu0 }
 0x106   :  { %v288_v35 = vmul.f32 0.70710677, %v232_v30  ;;  %1264 = vmatmul.mubr.f32.gmra.mxu1 %v1867_v31  ;;  %v314_v36 = vadd.f32 1.0, %v1503_v32  ;;  %v273_v4 = vmul.f32 0.5, %v232_v30 }
 0x107   :  { %v236_v37 = vpop.f32.mrf.mxu0  ;;  %1266 = vmatprep.mubr.msk.f32.mxu1 %vm1657_vm0, %v1656_v0 }
 0x108   :  { %1510 = verf.f32 %v288_v35  ;;  %v237_v38 = vadd.f32 %v1841_v44, %v236_v37  ;;  %v1873_v39 = vmul.f32 %v314_v36, %v269_v34 }
 0x109   :  { %v1505_v40 = vpop.eup %1504  ;;  %v1206_v41 = vpop.f32.mrf.mxu0 }
 0x10a   :  { %v289_v43 = vmul.f32 0.70710677, %v237_v38  ;;  %1267 = vmatmul.mubr.f32.gmra.mxu1 %v1873_v39  ;;  %v315_v45 = vadd.f32 1.0, %v1505_v40  ;;  %v274_v13 = vmul.f32 0.5, %v237_v38 }
 0x10b   :  { %v241_v46 = vpop.f32.mrf.mxu0  ;;  %1269 = vmatprep.mubr.msk.f32.mxu1 %vm1657_vm0, %v1656_v0 }
 0x10c   :  { %1512 = verf.f32 %v289_v43  ;;  %v242_v47 = vadd.f32 %v1841_v44, %v241_v46  ;;  %v1879_v48 = vmul.f32 %v315_v45, %v270_v42  ;;  %v599_v45 = vld [vmem:[#allocation2 + $0xa8] sm:$0xff]  ;;  %v598_v46 = vld [vmem:[#allocation2 + $0xa0] sm:$0xff] }
 0x10d   :  { %v1507_v49 = vpop.eup %1506  ;;  %v1209_v50 = vpop.f32.mrf.mxu0  ;;  %1320 = vmatpush3.msra.mxu0 %v599_v45 }
 0x10e   :  { %v290_v52 = vmul.f32 0.70710677, %v242_v47  ;;  %1270 = vmatmul.mubr.f32.gmra.mxu1 %v1879_v48  ;;  %v316_v53 = vadd.f32 1.0, %v1507_v49  ;;  %v275_v22 = vmul.f32 0.5, %v242_v47  ;;  %1321 = vmatprep.subr.mxu0 %v1656_v0  ;;  %v597_v47 = vld [vmem:[#allocation2 + $0x98] sm:$0xff]  ;;  %v596_v49 = vld [vmem:[#allocation2 + $0x90] sm:$0xff] }
 0x10f   :  { %v246_v54 = vpop.f32.mrf.mxu0  ;;  %1272 = vmatprep.mubr.msk.f32.mxu1 %vm1657_vm0, %v1656_v0  ;;  %1322 = vmatpush3.msra.mxu0 %v598_v46  ;;  %v595_v50 = vld [vmem:[#allocation2 + $0x88] sm:$0xff] }
 0x110   :  { %1514 = verf.f32 %v290_v52  ;;  %v247_v55 = vadd.f32 %v1841_v44, %v246_v54  ;;  %v1885_v56 = vmul.f32 %v316_v53, %v271_v51  ;;  %1323 = vmatprep.subr.mxu0 %v1656_v0  ;;  %v594_v51 = vld [vmem:[#allocation2 + $0x80] sm:$0xff]  ;;  %v1942_v52 = vld [vmem:[%s2228_s5 + $0x78] sm:$0xff]  ;;  %v1949_v53 = vld [vmem:[%s2228_s5 + $0x70] sm:$0xff] }
 0x111   :  { %v1509_v57 = vpop.eup %1508  ;;  %v1212_v58 = vpop.f32.mrf.mxu0  ;;  %1324 = vmatpush3.msra.mxu0 %v597_v47  ;;  %1469 = vmatpush3.msra.mxu1 %v1942_v52  ;;  %v1956_v54 = vld [vmem:[%s2228_s5 + $0x68] sm:$0xff] }
 0x112   :  { %v291_v60 = vmul.f32 0.70710677, %v247_v55  ;;  %1273 = vmatmul.mubr.f32.gmra.mxu1 %v1885_v56  ;;  %v317_v61 = vadd.f32 1.0, %v1509_v57  ;;  %v276_v28 = vmul.f32 0.5, %v247_v55  ;;  %1325 = vmatprep.subr.mxu0 %v1656_v0  ;;  %v1963_v55 = vld [vmem:[%s2228_s5 + $0x60] sm:$0xff]  ;;  %v1970_v57 = vld [vmem:[%s2228_s5 + $0x58] sm:$0xff] }
 0x113   :  { %v251_v62 = vpop.f32.mrf.mxu0  ;;  %1275 = vmatprep.mubr.msk.f32.mxu1 %vm1657_vm0, %v1656_v0  ;;  %1326 = vmatpush3.msra.mxu0 %v596_v49  ;;  %v1977_v58 = vld [vmem:[%s2228_s5 + $0x50] sm:$0xff] }
 0x114   :  { %1516 = verf.f32 %v291_v60  ;;  %v252_v63 = vadd.f32 %v1841_v44, %v251_v62  ;;  %v1891_v1 = vmul.f32 %v317_v61, %v272_v59  ;;  %1327 = vmatprep.subr.mxu0 %v1656_v0  ;;  %1454 = vmatprep.subr.mxu1 %v1656_v0  ;;  %v1981_v59 = vld [vmem:[#allocation5] ss:$0 sm:$0xff] }
 0x115   :  { %v1511_v2 = vpop.eup %1510  ;;  %v1215_v3 = vpop.f32.mrf.mxu0  ;;  %1328 = vmatpush3.msra.mxu0 %v595_v50  ;;  %1470 = vmatpush3.msra.mxu1 %v1949_v53 }
 0x116   :  { %v292_v5 = vmul.f32 0.70710677, %v252_v63  ;;  %1276 = vmatmul.mubr.f32.gmra.mxu1 %v1891_v1  ;;  %v318_v6 = vadd.f32 1.0, %v1511_v2  ;;  %v277_v32 = vmul.f32 0.5, %v252_v63  ;;  %1329 = vmatprep.subr.mxu0 %v1656_v0 }
 0x117   :  { %v256_v8 = vpop.f32.mrf.mxu0  ;;  %1278 = vmatprep.mubr.msk.f32.mxu1 %vm1657_vm0, %v1656_v0  ;;  %1330 = vmatpush3.msra.mxu0 %v594_v51 }
 0x118   :  { %1518 = verf.f32 %v292_v5  ;;  %v257_v9 = vadd.f32 %v1841_v44, %v256_v8  ;;  %v1897_v10 = vmul.f32 %v318_v6, %v273_v4  ;;  %1376 = vmatprep.subr.mxu0 %v1656_v0  ;;  %1455 = vmatprep.subr.mxu1 %v1656_v0 }
 0x119   :  { %v1513_v11 = vpop.eup %1512  ;;  %v1218_v12 = vpop.f32.mrf.mxu0  ;;  %1471 = vmatpush3.msra.mxu1 %v1956_v54 }
 0x11a   :  { %v293_v14 = vmul.f32 0.70710677, %v257_v9  ;;  %1279 = vmatmul.mubr.f32.gmra.mxu1 %v1897_v10  ;;  %v319_v16 = vadd.f32 1.0, %v1513_v11  ;;  %v278_v36 = vmul.f32 0.5, %v257_v9  ;;  %1456 = vmatprep.subr.mxu1 %v1656_v0 }
 0x11b   :  { %v261_v17 = vpop.f32.mrf.mxu0  ;;  %1281 = vmatprep.mubr.msk.f32.mxu1 %vm1657_vm0, %v1656_v0  ;;  %1472 = vmatpush3.msra.mxu1 %v1963_v55 }
 0x11c   :  { %1520 = verf.f32 %v293_v14  ;;  %v262_v18 = vadd.f32 %v1841_v44, %v261_v17  ;;  %v1903_v19 = vmul.f32 %v319_v16, %v274_v13  ;;  %1457 = vmatprep.subr.mxu1 %v1656_v0 }
 0x11d   :  { %v1515_v20 = vpop.eup %1514  ;;  %v1221_v21 = vpop.f32.mrf.mxu0  ;;  %1473 = vmatpush3.msra.mxu1 %v1970_v57 }
 0x11e   :  { %v294_v24 = vmul.f32 0.70710677, %v262_v18  ;;  %1282 = vmatmul.mubr.f32.gmra.mxu1 %v1903_v19  ;;  %v320_v25 = vadd.f32 1.0, %v1515_v20  ;;  %v279_v41 = vmul.f32 0.5, %v262_v18  ;;  %1458 = vmatprep.subr.mxu1 %v1656_v0 }
 0x11f   :  { %1284 = vmatprep.mubr.msk.f32.mxu1 %vm1657_vm0, %v1656_v0  ;;  %1474 = vmatpush3.msra.mxu1 %v1977_v58 }
 0x120   :  { %1522 = verf.f32 %v294_v24  ;;  %v1908_v26 = vmul.f32 %v320_v25, %v275_v22  ;;  %1459 = vmatprep.subr.mxu1 %v1656_v0 }
 0x121   :  { %v1517_v27 = vpop.eup %1516 }
 0x122   :  { %1285 = vmatmul.mubr.f32.gmra.mxu1 %v1908_v26  ;;  %v321_v44 = vadd.f32 1.0, %v1517_v27 }
 0x123   :  { %1287 = vmatprep.mubr.msk.f32.mxu1 %vm1657_vm0, %v1656_v0 }
 0x124   :  { %v1913_v29 = vmul.f32 %v321_v44, %v276_v28 }
 0x125   :  { %v1519_v30 = vpop.eup %1518 }
 0x126   :  { %1288 = vmatmul.mubr.f32.gmra.mxu1 %v1913_v29  ;;  %v322_v33 = vadd.f32 1.0, %v1519_v30 }
 0x127   :  { %1290 = vmatprep.mubr.msk.f32.mxu1 %vm1657_vm0, %v1656_v0 }
 0x128   :  { %v1918_v34 = vmul.f32 %v322_v33, %v277_v32 }
 0x129   :  { %v1521_v35 = vpop.eup %1520 }
 0x12a   :  { %1291 = vmatmul.mubr.f32.gmra.mxu1 %v1918_v34  ;;  %v323_v37 = vadd.f32 1.0, %v1521_v35 }
 0x12b   :  { %1293 = vmatprep.mubr.msk.f32.mxu1 %vm1657_vm0, %v1656_v0 }
 0x12c   :  { %v1923_v38 = vmul.f32 %v323_v37, %v278_v36 }
 0x12d   :  { %v1523_v40 = vpop.eup %1522 }
 0x12e   :  { %1294 = vmatmul.mubr.f32.gmra.mxu1 %v1923_v38  ;;  %v324_v42 = vadd.f32 1.0, %v1523_v40 }
 0x12f   :  { %1296 = vmatprep.mubr.msk.f32.mxu1 %vm1657_vm0, %v1656_v0 }
 0x130   :  { %v1928_v43 = vmul.f32 %v324_v42, %v279_v41 }
 0x132   :  { %1297 = vmatmul.mubr.f32.gmra.mxu1 %v1928_v43 }
 0x133   :  { %1417 = vmatprep.mubr.msk.f32.mxu1 %vm1657_vm0, %v1656_v0 }
 0x1ba   :  { %v429_v60 = vpop.f32.mrf.mxu1 }
 0x1bb   :  { %v430_v61 = vadd.f32 %v1981_v59, %v429_v60 }
 0x1bc   :  { %v1256_v62 = vpop.f32.mrf.mxu1 }
 0x1bd   :  { %v518_v63 = vmul.f32 0.70710677, %v430_v61  ;;  %v503_v22 = vmul.f32 0.5, %v430_v61 }
 0x1be   :  { %v434_v2 = vpop.f32.mrf.mxu1 }
 0x1bf   :  { %1524 = verf.f32 %v518_v63  ;;  %v435_v3 = vadd.f32 %v1981_v59, %v434_v2 }
 0x1c0   :  { %v1259_v4 = vpop.f32.mrf.mxu1 }
 0x1c1   :  { %v519_v5 = vmul.f32 0.70710677, %v435_v3  ;;  %v504_v35 = vmul.f32 0.5, %v435_v3 }
 0x1c2   :  { %v439_v6 = vpop.f32.mrf.mxu1 }
 0x1c3   :  { %1526 = verf.f32 %v519_v5  ;;  %v440_v8 = vadd.f32 %v1981_v59, %v439_v6 }
 0x1c4   :  { %v1262_v9 = vpop.f32.mrf.mxu1 }
 0x1c5   :  { %v520_v11 = vmul.f32 0.70710677, %v440_v8 }
 0x1c6   :  { %v444_v12 = vpop.f32.mrf.mxu1 }
 0x1c7   :  { %1528 = verf.f32 %v520_v11  ;;  %v445_v13 = vadd.f32 %v1981_v59, %v444_v12 }
 0x1c8   :  { %v1265_v14 = vpop.f32.mrf.mxu1 }
 0x1c9   :  { %v521_v16 = vmul.f32 0.70710677, %v445_v13 }
 0x1ca   :  { %v449_v17 = vpop.f32.mrf.mxu1 }
 0x1cb   :  { %1530 = verf.f32 %v521_v16  ;;  %v450_v18 = vadd.f32 %v1981_v59, %v449_v17 }
 0x1cc   :  { %v1525_v20 = vpop.eup %1524  ;;  %v1268_v21 = vpop.f32.mrf.mxu1 }
 0x1cd   :  { %v548_v24 = vadd.f32 1.0, %v1525_v20  ;;  %v522_v25 = vmul.f32 0.70710677, %v450_v18 }
 0x1ce   :  { %v454_v27 = vpop.f32.mrf.mxu1 }
 0x1cf   :  { %v563_v28 = vmul.f32 %v548_v24, %v503_v22  ;;  %1532 = verf.f32 %v522_v25  ;;  %v1989_v44 = vadd.f32 %v1981_v59, %v454_v27 }
 0x1d0   :  { %v1527_v30 = vpop.eup %1526  ;;  %v1271_v32 = vpop.f32.mrf.mxu1 }
 0x1d1   :  { %v1992_v33 = vadd.f32 %v563_v28, %v1849_v7  ;;  %v549_v36 = vadd.f32 1.0, %v1527_v30  ;;  %v523_v37 = vmul.f32 0.70710677, %v1989_v44  ;;  %v505_v7 = vmul.f32 0.5, %v440_v8 }
 0x1d2   :  { %v459_v40 = vpop.f32.mrf.mxu1 }
 0x1d3   :  { %v564_v41 = vmul.f32 %v549_v36, %v504_v35  ;;  %1534 = verf.f32 %v523_v37  ;;  %v1996_v42 = vadd.f32 %v1981_v59, %v459_v40  ;;  %1332 = vmatmul.mubr.f32.vlgmr.msra.gmra.mxu0 %v1992_v33 }
 0x1d4   :  { %v1529_v45 = vpop.eup %1528  ;;  %v1274_v46 = vpop.f32.mrf.mxu1  ;;  %1334 = vmatprep.mubr.msk.f32.mxu0 %vm1657_vm0, %v1656_v0  ;;  %1377 = vmatpush3.msra.mxu0 %v1942_v52 }
 0x1d5   :  { %v550_v47 = vadd.f32 1.0, %v1529_v45  ;;  %v524_v49 = vmul.f32 0.70710677, %v1996_v42  ;;  %v2004_v50 = vadd.f32 %v564_v41, %v1855_v15  ;;  %1378 = vmatprep.subr.mxu0 %v1656_v0  ;;  %v506_v15 = vmul.f32 0.5, %v445_v13 }
 0x1d6   :  { %v464_v51 = vpop.f32.mrf.mxu1  ;;  %1379 = vmatpush3.msra.mxu0 %v1949_v53  ;;  %v509_v25 = vmul.f32 0.5, %v1996_v42 }
 0x1d7   :  { %v565_v60 = vmul.f32 %v550_v47, %v505_v7  ;;  %1536 = verf.f32 %v524_v49  ;;  %v465_v61 = vadd.f32 %v1981_v59, %v464_v51  ;;  %1335 = vmatmul.mubr.f32.gmra.mxu0 %v2004_v50  ;;  %1380 = vmatprep.subr.mxu0 %v1656_v0 }
 0x1d8   :  { %v1531_v52 = vpop.eup %1530  ;;  %v1277_v62 = vpop.f32.mrf.mxu1  ;;  %1337 = vmatprep.mubr.msk.f32.mxu0 %vm1657_vm0, %v1656_v0  ;;  %1381 = vmatpush3.msra.mxu0 %v1956_v54 }
 0x1d9   :  { %v551_v63 = vadd.f32 1.0, %v1531_v52  ;;  %v525_v2 = vmul.f32 0.70710677, %v465_v61  ;;  %v2015_v53 = vadd.f32 %v565_v60, %v1861_v23  ;;  %1382 = vmatprep.subr.mxu0 %v1656_v0  ;;  %v507_v23 = vmul.f32 0.5, %v450_v18 }
 0x1da   :  { %v469_v3 = vpop.f32.mrf.mxu1  ;;  %1383 = vmatpush3.msra.mxu0 %v1963_v55  ;;  %v510_v37 = vmul.f32 0.5, %v465_v61 }
 0x1db   :  { %v566_v4 = vmul.f32 %v551_v63, %v506_v15  ;;  %1538 = verf.f32 %v525_v2  ;;  %v470_v5 = vadd.f32 %v1981_v59, %v469_v3  ;;  %1338 = vmatmul.mubr.f32.gmra.mxu0 %v2015_v53  ;;  %1384 = vmatprep.subr.mxu0 %v1656_v0 }
 0x1dc   :  { %v1533_v54 = vpop.eup %1532  ;;  %v1280_v6 = vpop.f32.mrf.mxu1  ;;  %1340 = vmatprep.mubr.msk.f32.mxu0 %vm1657_vm0, %v1656_v0  ;;  %1385 = vmatpush3.msra.mxu0 %v1970_v57 }
 0x1dd   :  { %v552_v8 = vadd.f32 1.0, %v1533_v54  ;;  %v526_v9 = vmul.f32 0.70710677, %v470_v5  ;;  %v2026_v55 = vadd.f32 %v566_v4, %v1867_v31  ;;  %1386 = vmatprep.subr.mxu0 %v1656_v0  ;;  %v508_v31 = vmul.f32 0.5, %v1989_v44 }
 0x1de   :  { %v474_v11 = vpop.f32.mrf.mxu1  ;;  %1387 = vmatpush3.msra.mxu0 %v1977_v58  ;;  %v511_v49 = vmul.f32 0.5, %v470_v5 }
 0x1df   :  { %v567_v12 = vmul.f32 %v552_v8, %v507_v23  ;;  %1540 = verf.f32 %v526_v9  ;;  %v475_v13 = vadd.f32 %v1981_v59, %v474_v11  ;;  %1341 = vmatmul.mubr.f32.gmra.mxu0 %v2026_v55  ;;  %1388 = vmatprep.subr.mxu0 %v1656_v0 }
 0x1e0   :  { %v1535_v57 = vpop.eup %1534  ;;  %v1283_v14 = vpop.f32.mrf.mxu1  ;;  %1343 = vmatprep.mubr.msk.f32.mxu0 %vm1657_vm0, %v1656_v0 }
 0x1e1   :  { %v553_v16 = vadd.f32 1.0, %v1535_v57  ;;  %v527_v17 = vmul.f32 0.70710677, %v475_v13  ;;  %v2037_v18 = vadd.f32 %v567_v12, %v1873_v39  ;;  %v512_v2 = vmul.f32 0.5, %v475_v13 }
 0x1e2   :  { %v479_v58 = vpop.f32.mrf.mxu1 }
 0x1e3   :  { %v568_v20 = vmul.f32 %v553_v16, %v508_v31  ;;  %1542 = verf.f32 %v527_v17  ;;  %v480_v21 = vadd.f32 %v1981_v59, %v479_v58  ;;  %1344 = vmatmul.mubr.f32.gmra.mxu0 %v2037_v18 }
 0x1e4   :  { %v1537_v22 = vpop.eup %1536  ;;  %v1286_v24 = vpop.f32.mrf.mxu1  ;;  %1346 = vmatprep.mubr.msk.f32.mxu0 %vm1657_vm0, %v1656_v0 }
 0x1e5   :  { %v554_v27 = vadd.f32 1.0, %v1537_v22  ;;  %v528_v28 = vmul.f32 0.70710677, %v480_v21  ;;  %v2045_v44 = vadd.f32 %v568_v20, %v1879_v48  ;;  %v513_v9 = vmul.f32 0.5, %v480_v21 }
 0x1e6   :  { %v484_v39 = vpop.f32.mrf.mxu1 }
 0x1e7   :  { %v569_v30 = vmul.f32 %v554_v27, %v509_v25  ;;  %1544 = verf.f32 %v528_v28  ;;  %v485_v32 = vadd.f32 %v1981_v59, %v484_v39  ;;  %1347 = vmatmul.mubr.f32.gmra.mxu0 %v2045_v44 }
 0x1e8   :  { %v1539_v35 = vpop.eup %1538  ;;  %v1289_v36 = vpop.f32.mrf.mxu1  ;;  %1349 = vmatprep.mubr.msk.f32.mxu0 %vm1657_vm0, %v1656_v0 }
 0x1e9   :  { %v555_v40 = vadd.f32 1.0, %v1539_v35  ;;  %v529_v41 = vmul.f32 0.70710677, %v485_v32  ;;  %v2052_v42 = vadd.f32 %v569_v30, %v1885_v56  ;;  %v857_v35 = vld [vmem:[%s2228_s5 + $0x48] sm:$0xff]  ;;  %v854_v36 = vld [vmem:[%s2228_s5 + $0x30] sm:$0xff] }
 0x1ea   :  { %v489_v48 = vpop.f32.mrf.mxu1  ;;  %1475 = vmatpush3.msra.mxu1 %v857_v35  ;;  %1389 = vmatpush3.msra.mxu0 %v857_v35 }
 0x1eb   :  { %v570_v45 = vmul.f32 %v555_v40, %v510_v37  ;;  %1546 = verf.f32 %v529_v41  ;;  %v490_v46 = vadd.f32 %v1981_v59, %v489_v48  ;;  %1350 = vmatmul.mubr.f32.gmra.mxu0 %v2052_v42  ;;  %1460 = vmatprep.subr.mxu1 %v1656_v0  ;;  %v853_v37 = vld [vmem:[%s2228_s5 + $0x28] sm:$0xff]  ;;  %v852_v40 = vld [vmem:[%s2228_s5 + $0x20] sm:$0xff]  ;;  %v851_v41 = vld [vmem:[%s2228_s5 + $0x18] sm:$0xff] }
 0x1ec   :  { %v1541_v7 = vpop.eup %1540  ;;  %v1292_v47 = vpop.f32.mrf.mxu1  ;;  %1352 = vmatprep.mubr.msk.f32.mxu0 %vm1657_vm0, %v1656_v0  ;;  %1390 = vmatprep.subr.mxu0 %v1656_v0  ;;  %v850_v48 = vld [vmem:[%s2228_s5 + $0x10] sm:$0xff] }
 0x1ed   :  { %v556_v51 = vadd.f32 1.0, %v1541_v7  ;;  %v530_v60 = vmul.f32 0.70710677, %v490_v46  ;;  %v2059_v61 = vadd.f32 %v570_v45, %v1891_v1  ;;  %v849_v45 = vld [vmem:[%s2228_s5 + $0x8] sm:$0xff]  ;;  %v2156_v7 = vld [vmem:[#allocation5 + $0x1] ss:$0 sm:$0xff] }
 0x1ee   :  { %v494_v56 = vpop.f32.mrf.mxu1 }
 0x1ef   :  { %v571_v52 = vmul.f32 %v556_v51, %v511_v49  ;;  %1548 = verf.f32 %v530_v60  ;;  %v495_v62 = vadd.f32 %v1981_v59, %v494_v56  ;;  %1353 = vmatmul.mubr.f32.gmra.mxu0 %v2059_v61 }
 0x1f0   :  { %v1543_v15 = vpop.eup %1542  ;;  %v1295_v63 = vpop.f32.mrf.mxu1  ;;  %1355 = vmatprep.mubr.msk.f32.mxu0 %vm1657_vm0, %v1656_v0 }
 0x1f1   :  { %v557_v3 = vadd.f32 1.0, %v1543_v15  ;;  %v531_v4 = vmul.f32 0.70710677, %v495_v62  ;;  %v2066_v5 = vadd.f32 %v571_v52, %v1897_v10 }
 0x1f2   :  { %v499_v1 = vpop.f32.mrf.mxu1 }
 0x1f3   :  { %v572_v54 = vmul.f32 %v557_v3, %v512_v2  ;;  %1550 = verf.f32 %v531_v4  ;;  %v500_v6 = vadd.f32 %v1981_v59, %v499_v1  ;;  %1356 = vmatmul.mubr.f32.gmra.mxu0 %v2066_v5  ;;  %v514_v59 = vmul.f32 0.5, %v485_v32 }
 0x1f4   :  { %v1545_v23 = vpop.eup %1544  ;;  %v1298_v8 = vpop.f32.mrf.mxu1  ;;  %1358 = vmatprep.mubr.msk.f32.mxu0 %vm1657_vm0, %v1656_v0 }
 0x1f5   :  { %v558_v11 = vadd.f32 1.0, %v1545_v23  ;;  %v532_v12 = vmul.f32 0.70710677, %v500_v6  ;;  %v2073_v13 = vadd.f32 %v572_v54, %v1903_v19  ;;  %v515_v19 = vmul.f32 0.5, %v490_v46  ;;  %v848_v46 = vld [vmem:[%s2228_s5] sm:$0xff] }
 0x1f7   :  { %v573_v10 = vmul.f32 %v558_v11, %v513_v9  ;;  %1552 = verf.f32 %v532_v12  ;;  %1359 = vmatmul.mubr.f32.gmra.mxu0 %v2073_v13 }
 0x1f8   :  { %v1547_v57 = vpop.eup %1546  ;;  %1361 = vmatprep.mubr.msk.f32.mxu0 %vm1657_vm0, %v1656_v0 }
 0x1f9   :  { %v559_v14 = vadd.f32 1.0, %v1547_v57  ;;  %v2079_v31 = vadd.f32 %v573_v10, %v1908_v26  ;;  %v516_v26 = vmul.f32 0.5, %v495_v62 }
 0x1fb   :  { %v574_v16 = vmul.f32 %v559_v14, %v514_v59  ;;  %1362 = vmatmul.mubr.f32.gmra.mxu0 %v2079_v31 }
 0x1fc   :  { %v1549_v17 = vpop.eup %1548  ;;  %1364 = vmatprep.mubr.msk.f32.mxu0 %vm1657_vm0, %v1656_v0 }
 0x1fd   :  { %v560_v58 = vadd.f32 1.0, %v1549_v17  ;;  %v2085_v20 = vadd.f32 %v574_v16, %v1913_v29  ;;  %v517_v29 = vmul.f32 0.5, %v500_v6 }
 0x1ff   :  { %v575_v21 = vmul.f32 %v560_v58, %v515_v19  ;;  %1365 = vmatmul.mubr.f32.gmra.mxu0 %v2085_v20 }
 0x200   :  { %v1551_v22 = vpop.eup %1550  ;;  %1367 = vmatprep.mubr.msk.f32.mxu0 %vm1657_vm0, %v1656_v0 }
 0x201   :  { %v561_v24 = vadd.f32 1.0, %v1551_v22  ;;  %v2091_v25 = vadd.f32 %v575_v21, %v1918_v34 }
 0x203   :  { %v576_v27 = vmul.f32 %v561_v24, %v516_v26  ;;  %1368 = vmatmul.mubr.f32.gmra.mxu0 %v2091_v25 }
 0x204   :  { %v1553_v28 = vpop.eup %1552  ;;  %1370 = vmatprep.mubr.msk.f32.mxu0 %vm1657_vm0, %v1656_v0 }
 0x205   :  { %v562_v39 = vadd.f32 1.0, %v1553_v28  ;;  %v2097_v30 = vadd.f32 %v576_v27, %v1923_v38  ;;  %v856_v38 = vld [vmem:[%s2228_s5 + $0x40] sm:$0xff] }
 0x206   :  { %1476 = vmatpush3.msra.mxu1 %v856_v38  ;;  %1391 = vmatpush3.msra.mxu0 %v856_v38 }
 0x207   :  { %v577_v32 = vmul.f32 %v562_v39, %v517_v29  ;;  %1371 = vmatmul.mubr.f32.gmra.mxu0 %v2097_v30  ;;  %1461 = vmatprep.subr.mxu1 %v1656_v0 }
 0x208   :  { %1373 = vmatprep.mubr.msk.f32.mxu0 %vm1657_vm0, %v1656_v0  ;;  %1392 = vmatprep.subr.mxu0 %v1656_v0 }
 0x209   :  { %v2103_v34 = vadd.f32 %v577_v32, %v1928_v43  ;;  %v855_v43 = vld [vmem:[%s2228_s5 + $0x38] sm:$0xff] }
 0x20a   :  { %1477 = vmatpush3.msra.mxu1 %v855_v43  ;;  %1393 = vmatpush3.msra.mxu0 %v855_v43 }
 0x20b   :  { %1374 = vmatmul.mubr.f32.gmra.mxu0 %v2103_v34  ;;  %1462 = vmatprep.subr.mxu1 %v1656_v0 }
 0x20c   :  { %1408 = vmatprep.mubr.msk.f32.mxu0 %vm1657_vm0, %v1656_v0  ;;  %1394 = vmatprep.subr.mxu0 %v1656_v0 }
 0x20d   :  { %1478 = vmatpush3.msra.mxu1 %v854_v36  ;;  %1395 = vmatpush3.msra.mxu0 %v854_v36 }
 0x20e   :  { %1396 = vmatprep.subr.mxu0 %v1656_v0  ;;  %1463 = vmatprep.subr.mxu1 %v1656_v0 }
 0x20f   :  { %1397 = vmatpush3.msra.mxu0 %v853_v37  ;;  %1479 = vmatpush3.msra.mxu1 %v853_v37 }
 0x210   :  { %1398 = vmatprep.subr.mxu0 %v1656_v0  ;;  %1464 = vmatprep.subr.mxu1 %v1656_v0 }
 0x211   :  { %1399 = vmatpush3.msra.mxu0 %v852_v40  ;;  %1480 = vmatpush3.msra.mxu1 %v852_v40 }
 0x212   :  { %1400 = vmatprep.subr.mxu0 %v1656_v0  ;;  %1465 = vmatprep.subr.mxu1 %v1656_v0 }
 0x213   :  { %1401 = vmatpush3.msra.mxu0 %v851_v41  ;;  %1481 = vmatpush3.msra.mxu1 %v851_v41 }
 0x214   :  { %1402 = vmatprep.subr.mxu0 %v1656_v0  ;;  %1466 = vmatprep.subr.mxu1 %v1656_v0 }
 0x215   :  { %1403 = vmatpush3.msra.mxu0 %v850_v48  ;;  %1482 = vmatpush3.msra.mxu1 %v850_v48 }
 0x216   :  { %1404 = vmatprep.subr.mxu0 %v1656_v0  ;;  %1467 = vmatprep.subr.mxu1 %v1656_v0 }
 0x217   :  { %1405 = vmatpush3.msra.mxu0 %v849_v45  ;;  %1483 = vmatpush3.msra.mxu1 %v849_v45 }
 0x218   :  { %1406 = vmatprep.subr.mxu0 %v1656_v0  ;;  %1468 = vmatprep.subr.mxu1 %v1656_v0 }
 0x219   :  { %1407 = vmatpush3.msra.mxu0 %v848_v46  ;;  %1484 = vmatpush3.msra.mxu1 %v848_v46 }
 0x293   :  { %v684_v47 = vpop.f32.mrf.mxu0 }
 0x294   :  { %v685_v49 = vadd.f32 %v2156_v7, %v684_v47 }
 0x295   :  { %v1333_v51 = vpop.f32.mrf.mxu0 }
 0x296   :  { %v773_v60 = vmul.f32 0.70710677, %v685_v49  ;;  %v758_v10 = vmul.f32 0.5, %v685_v49 }
 0x297   :  { %v689_v56 = vpop.f32.mrf.mxu0 }
 0x298   :  { %1554 = verf.f32 %v773_v60  ;;  %v690_v52 = vadd.f32 %v2156_v7, %v689_v56 }
 0x299   :  { %v1336_v62 = vpop.f32.mrf.mxu0 }
 0x29a   :  { %v774_v15 = vmul.f32 0.70710677, %v690_v52  ;;  %v759_v22 = vmul.f32 0.5, %v690_v52 }
 0x29b   :  { %v694_v63 = vpop.f32.mrf.mxu0 }
 0x29c   :  { %1556 = verf.f32 %v774_v15  ;;  %v695_v2 = vadd.f32 %v2156_v7, %v694_v63 }
 0x29d   :  { %v1339_v3 = vpop.f32.mrf.mxu0 }
 0x29e   :  { %v775_v4 = vmul.f32 0.70710677, %v695_v2  ;;  %v760_v35 = vmul.f32 0.5, %v695_v2 }
 0x29f   :  { %v699_v1 = vpop.f32.mrf.mxu0 }
 0x2a0   :  { %1558 = verf.f32 %v775_v4  ;;  %v700_v54 = vadd.f32 %v2156_v7, %v699_v1 }
 0x2a1   :  { %v1342_v6 = vpop.f32.mrf.mxu0 }
 0x2a2   :  { %v776_v23 = vmul.f32 0.70710677, %v700_v54  ;;  %v761_v45 = vmul.f32 0.5, %v700_v54 }
 0x2a3   :  { %v704_v8 = vpop.f32.mrf.mxu0 }
 0x2a4   :  { %1560 = verf.f32 %v776_v23  ;;  %v705_v9 = vadd.f32 %v2156_v7, %v704_v8 }
 0x2a5   :  { %v1555_v11 = vpop.eup %1554  ;;  %v1345_v12 = vpop.f32.mrf.mxu0 }
 0x2a6   :  { %v803_v57 = vadd.f32 1.0, %v1555_v11  ;;  %v777_v59 = vmul.f32 0.70710677, %v705_v9  ;;  %v762_v15 = vmul.f32 0.5, %v705_v9 }
 0x2a7   :  { %v709_v14 = vpop.f32.mrf.mxu0 }
 0x2a8   :  { %v818_v16 = vmul.f32 %v803_v57, %v758_v10  ;;  %1562 = verf.f32 %v777_v59  ;;  %v710_v17 = vadd.f32 %v2156_v7, %v709_v14 }
 0x2a9   :  { %v1557_v19 = vpop.eup %1556  ;;  %v1348_v58 = vpop.f32.mrf.mxu0 }
 0x2aa   :  { %v833_v21 = vadd.f32 %v818_v16, %v1992_v33  ;;  %v804_v26 = vadd.f32 1.0, %v1557_v19  ;;  %v778_v24 = vmul.f32 0.70710677, %v710_v17  ;;  %v763_v6 = vmul.f32 0.5, %v710_v17 }
 0x2ab   :  { %v714_v27 = vpop.f32.mrf.mxu0 }
 0x2ac   :  { %v819_v28 = vmul.f32 %v804_v26, %v759_v22  ;;  %1564 = verf.f32 %v778_v24  ;;  %v715_v29 = vadd.f32 %v2156_v7, %v714_v27  ;;  %1409 = vmatmul.mubr.f32.vlgmr.msra.gmra.mxu0 %v833_v21 }
 0x2ad   :  { %v1559_v39 = vpop.eup %1558  ;;  %v1351_v32 = vpop.f32.mrf.mxu0  ;;  %1411 = vmatprep.mubr.msk.f32.mxu0 %vm1657_vm0, %v1656_v0 }
 0x2ae   :  { %v805_v38 = vadd.f32 1.0, %v1559_v39  ;;  %v779_v43 = vmul.f32 0.70710677, %v715_v29  ;;  %v834_v36 = vadd.f32 %v819_v28, %v2004_v50  ;;  %v764_v59 = vmul.f32 0.5, %v715_v29 }
 0x2af   :  { %v719_v33 = vpop.f32.mrf.mxu0 }
 0x2b0   :  { %v820_v37 = vmul.f32 %v805_v38, %v760_v35  ;;  %1566 = verf.f32 %v779_v43  ;;  %v720_v40 = vadd.f32 %v2156_v7, %v719_v33  ;;  %1412 = vmatmul.mubr.f32.gmra.mxu0 %v834_v36 }
 0x2b1   :  { %v1561_v41 = vpop.eup %1560  ;;  %v1354_v48 = vpop.f32.mrf.mxu0  ;;  %1414 = vmatprep.mubr.msk.f32.mxu0 %vm1657_vm0, %v1656_v0 }
 0x2b2   :  { %v806_v46 = vadd.f32 1.0, %v1561_v41  ;;  %v780_v47 = vmul.f32 0.70710677, %v720_v40  ;;  %v835_v49 = vadd.f32 %v820_v37, %v2015_v53  ;;  %v765_v26 = vmul.f32 0.5, %v720_v40 }
 0x2b3   :  { %v724_v51 = vpop.f32.mrf.mxu0 }
 0x2b4   :  { %v821_v60 = vmul.f32 %v806_v46, %v761_v45  ;;  %1568 = verf.f32 %v780_v47  ;;  %v725_v50 = vadd.f32 %v2156_v7, %v724_v51  ;;  %1415 = vmatmul.mubr.f32.gmra.mxu0 %v835_v49 }
 0x2b5   :  { %v1563_v56 = vpop.eup %1562  ;;  %v1357_v52 = vpop.f32.mrf.mxu0 }
 0x2b6   :  { %v836_v62 = vadd.f32 %v821_v60, %v2026_v55  ;;  %v807_v63 = vadd.f32 1.0, %v1563_v56  ;;  %v781_v2 = vmul.f32 0.70710677, %v725_v50  ;;  %v766_v38 = vmul.f32 0.5, %v725_v50 }
 0x2b7   :  { %v729_v3 = vpop.f32.mrf.mxu0 }
 0x2b8   :  { %v822_v4 = vmul.f32 %v807_v63, %v762_v15  ;;  %1570 = verf.f32 %v781_v2  ;;  %v730_v1 = vadd.f32 %v2156_v7, %v729_v3  ;;  %1418 = vmatmul.mubr.f32.vlgmr.msra.gmra.mxu1 %v836_v62 }
 0x2b9   :  { %v1565_v53 = vpop.eup %1564  ;;  %v1360_v54 = vpop.f32.mrf.mxu0  ;;  %1420 = vmatprep.mubr.msk.f32.mxu1 %vm1657_vm0, %v1656_v0 }
 0x2ba   :  { %v808_v23 = vadd.f32 1.0, %v1565_v53  ;;  %v782_v8 = vmul.f32 0.70710677, %v730_v1  ;;  %v837_v11 = vadd.f32 %v822_v4, %v2037_v18  ;;  %v767_v45 = vmul.f32 0.5, %v730_v1 }
 0x2bb   :  { %v734_v55 = vpop.f32.mrf.mxu0 }
 0x2bc   :  { %v823_v9 = vmul.f32 %v808_v23, %v763_v6  ;;  %1572 = verf.f32 %v782_v8  ;;  %v735_v12 = vadd.f32 %v2156_v7, %v734_v55  ;;  %1421 = vmatmul.mubr.f32.gmra.mxu1 %v837_v11 }
 0x2bd   :  { %v1567_v10 = vpop.eup %1566  ;;  %v1363_v57 = vpop.f32.mrf.mxu0  ;;  %1423 = vmatprep.mubr.msk.f32.mxu1 %vm1657_vm0, %v1656_v0 }
 0x2be   :  { %v809_v14 = vadd.f32 1.0, %v1567_v10  ;;  %v783_v16 = vmul.f32 0.70710677, %v735_v12  ;;  %v838_v17 = vadd.f32 %v823_v9, %v2045_v44  ;;  %v768_v52 = vmul.f32 0.5, %v735_v12 }
 0x2bf   :  { %v739_v19 = vpop.f32.mrf.mxu0 }
 0x2c0   :  { %v824_v58 = vmul.f32 %v809_v14, %v764_v59  ;;  %1574 = verf.f32 %v783_v16  ;;  %v740_v18 = vadd.f32 %v2156_v7, %v739_v19  ;;  %1424 = vmatmul.mubr.f32.gmra.mxu1 %v838_v17 }
 0x2c1   :  { %v1569_v21 = vpop.eup %1568  ;;  %v1366_v22 = vpop.f32.mrf.mxu0  ;;  %1426 = vmatprep.mubr.msk.f32.mxu1 %vm1657_vm0, %v1656_v0 }
 0x2c2   :  { %v810_v24 = vadd.f32 1.0, %v1569_v21  ;;  %v784_v27 = vmul.f32 0.70710677, %v740_v18  ;;  %v839_v28 = vadd.f32 %v824_v58, %v2052_v42  ;;  %v769_v3 = vmul.f32 0.5, %v740_v18 }
 0x2c3   :  { %v744_v29 = vpop.f32.mrf.mxu0 }
 0x2c4   :  { %v825_v39 = vmul.f32 %v810_v24, %v765_v26  ;;  %1576 = verf.f32 %v784_v27  ;;  %v745_v44 = vadd.f32 %v2156_v7, %v744_v29  ;;  %1427 = vmatmul.mubr.f32.gmra.mxu1 %v839_v28 }
 0x2c5   :  { %v1571_v32 = vpop.eup %1570  ;;  %v1369_v35 = vpop.f32.mrf.mxu0  ;;  %1429 = vmatprep.mubr.msk.f32.mxu1 %vm1657_vm0, %v1656_v0 }
 0x2c6   :  { %v811_v43 = vadd.f32 1.0, %v1571_v32  ;;  %v785_v36 = vmul.f32 0.70710677, %v745_v44  ;;  %v840_v33 = vadd.f32 %v825_v39, %v2059_v61  ;;  %v770_v54 = vmul.f32 0.5, %v745_v44 }
 0x2c7   :  { %v749_v37 = vpop.f32.mrf.mxu0 }
 0x2c8   :  { %v826_v40 = vmul.f32 %v811_v43, %v766_v38  ;;  %1578 = verf.f32 %v785_v36  ;;  %v750_v42 = vadd.f32 %v2156_v7, %v749_v37  ;;  %1430 = vmatmul.mubr.f32.gmra.mxu1 %v840_v33 }
 0x2c9   :  { %v1573_v41 = vpop.eup %1572  ;;  %v1372_v48 = vpop.f32.mrf.mxu0  ;;  %1432 = vmatprep.mubr.msk.f32.mxu1 %vm1657_vm0, %v1656_v0 }
 0x2ca   :  { %v812_v46 = vadd.f32 1.0, %v1573_v41  ;;  %v786_v47 = vmul.f32 0.70710677, %v750_v42  ;;  %v841_v49 = vadd.f32 %v826_v40, %v2066_v5  ;;  %v771_v11 = vmul.f32 0.5, %v750_v42 }
 0x2cb   :  { %v754_v51 = vpop.f32.mrf.mxu0 }
 0x2cc   :  { %v827_v60 = vmul.f32 %v812_v46, %v767_v45  ;;  %1580 = verf.f32 %v786_v47  ;;  %v755_v61 = vadd.f32 %v2156_v7, %v754_v51  ;;  %1433 = vmatmul.mubr.f32.gmra.mxu1 %v841_v49 }
 0x2cd   :  { %v1575_v50 = vpop.eup %1574  ;;  %v1375_v56 = vpop.f32.mrf.mxu0  ;;  %1435 = vmatprep.mubr.msk.f32.mxu1 %vm1657_vm0, %v1656_v0 }
 0x2ce   :  { %v813_v62 = vadd.f32 1.0, %v1575_v50  ;;  %v787_v15 = vmul.f32 0.70710677, %v755_v61  ;;  %v842_v63 = vadd.f32 %v827_v60, %v2073_v13  ;;  %v772_v10 = vmul.f32 0.5, %v755_v61 }
 0x2d0   :  { %v828_v2 = vmul.f32 %v813_v62, %v768_v52  ;;  %1582 = verf.f32 %v787_v15  ;;  %1436 = vmatmul.mubr.f32.gmra.mxu1 %v842_v63 }
 0x2d1   :  { %v1577_v5 = vpop.eup %1576  ;;  %1438 = vmatprep.mubr.msk.f32.mxu1 %vm1657_vm0, %v1656_v0 }
 0x2d2   :  { %v814_v7 = vadd.f32 1.0, %v1577_v5  ;;  %v843_v4 = vadd.f32 %v828_v2, %v2079_v31 }
 0x2d4   :  { %v829_v1 = vmul.f32 %v814_v7, %v769_v3  ;;  %1439 = vmatmul.mubr.f32.gmra.mxu1 %v843_v4 }
 0x2d5   :  { %v1579_v53 = vpop.eup %1578  ;;  %1441 = vmatprep.mubr.msk.f32.mxu1 %vm1657_vm0, %v1656_v0 }
 0x2d6   :  { %v815_v6 = vadd.f32 1.0, %v1579_v53  ;;  %v844_v13 = vadd.f32 %v829_v1, %v2085_v20 }
 0x2d8   :  { %v830_v23 = vmul.f32 %v815_v6, %v770_v54  ;;  %1442 = vmatmul.mubr.f32.gmra.mxu1 %v844_v13 }
 0x2d9   :  { %v1581_v8 = vpop.eup %1580  ;;  %1444 = vmatprep.mubr.msk.f32.mxu1 %vm1657_vm0, %v1656_v0 }
 0x2da   :  { %v816_v55 = vadd.f32 1.0, %v1581_v8  ;;  %v845_v31 = vadd.f32 %v830_v23, %v2091_v25  ;;  %v1062_v25 = vld [vmem:[%s2229_s6] ss:$0 sm:$0xff]  ;;  %s1658_s6 = smov [#allocation7]  }
 0x2db   :  { %s1031_s8 = sshll.u32 %s1658_s6, 4  ;;  %s1032_s8 = int_to_ptr.vmem [resolvable:$true] %s1031_s8 }
 0x2dc   :  { %v831_v9 = vmul.f32 %v816_v55, %v771_v11  ;;  %1445 = vmatmul.mubr.f32.gmra.mxu1 %v845_v31  ;;  %s1624_s9 = scalar_lea.vmem %s1032_s8, 1920  ;;  %p1629_p11 = scmp.lt.s32.totalorder %s1032_s8, %s1032_s8 }
 0x2dd   :  { %v1583_v12 = vpop.eup %1582  ;;  %1447 = vmatprep.mubr.msk.f32.mxu1 %vm1657_vm0, %v1656_v0  ;;  %p1625_p10 = scmp.ne.s32.totalorder %s1032_s8, %s1624_s9  ;;  %p1630_p12 = scmp.lt.s32.totalorder %s1624_s9, %s1624_s9 }
 0x2de   :  { %v817_v57 = vadd.f32 1.0, %v1583_v12  ;;  %v846_v20 = vadd.f32 %v831_v9, %v2097_v30 }
 0x2df   :  { %p1631_p13 = por %p1630_p12, %p1629_p11 }
 0x2e0   :  { %v832_v59 = vmul.f32 %v817_v57, %v772_v10  ;;  %1448 = vmatmul.mubr.f32.gmra.mxu1 %v846_v20 }
 0x2e1   :  { %1450 = vmatprep.mubr.msk.f32.mxu1 %vm1657_vm0, %v1656_v0  ;;  %p1632_p0 = pnand %p1631_p13, %p1625_p10 }
 0x2e2   :  { %v847_v14 = vadd.f32 %v832_v59, %v2103_v34 }
 0x2e4   :  { %1451 = vmatmul.mubr.f32.gmra.mxu1 %v847_v14 }
 0x36c   :  { %v937_v16 = vpop.f32.mrf.mxu0 }
 0x36d   :  { %v938_v17 = vadd.f32 %v1062_v25, %v937_v16 }
 0x36e   :  { %v1410_v19 = vpop.f32.mrf.mxu0 }
 0x36f   :  { %1011 = vst [vmem:[#allocation7] sm:$0xff] %v938_v17 }
 0x370   :  { %v942_v58 = vpop.f32.mrf.mxu0 }
 0x371   :  { %v943_v18 = vadd.f32 %v1062_v25, %v942_v58 }
 0x372   :  { %v1413_v21 = vpop.f32.mrf.mxu0 }
 0x373   :  { %1012 = vst [vmem:[#allocation7 + $0x8] sm:$0xff] %v943_v18 }
 0x374   :  { %v947_v30 = vpop.f32.mrf.mxu0 }
 0x375   :  { %v948_v22 = vadd.f32 %v1062_v25, %v947_v30 }
 0x376   :  { %v1416_v26 = vpop.f32.mrf.mxu0 }
 0x377   :  { %1013 = vst [vmem:[#allocation7 + $0x10] sm:$0xff] %v948_v22 }
 0x378   :  { %v952_v0 = vpop.f32.mrf.mxu1 }
 0x379   :  { %v953_v24 = vadd.f32 %v1062_v25, %v952_v0 }
 0x37a   :  { %v1419_v34 = vpop.f32.mrf.mxu1 }
 0x37b   :  { %1014 = vst [vmem:[#allocation7 + $0x18] sm:$0xff] %v953_v24 }
 0x37c   :  { %v957_v27 = vpop.f32.mrf.mxu1 }
 0x37d   :  { %v958_v28 = vadd.f32 %v1062_v25, %v957_v27 }
 0x37e   :  { %v1422_v29 = vpop.f32.mrf.mxu1 }
 0x37f   :  { %1015 = vst [vmem:[#allocation7 + $0x20] sm:$0xff] %v958_v28 }
 0x380   :  { %v962_v39 = vpop.f32.mrf.mxu1 }
 0x381   :  { %v963_v44 = vadd.f32 %v1062_v25, %v962_v39 }
 0x382   :  { %v1425_v32 = vpop.f32.mrf.mxu1 }
 0x383   :  { %1016 = vst [vmem:[#allocation7 + $0x28] sm:$0xff] %v963_v44 }
 0x384   :  { %v967_v35 = vpop.f32.mrf.mxu1 }
 0x385   :  { %v968_v38 = vadd.f32 %v1062_v25, %v967_v35 }
 0x386   :  { %v1428_v43 = vpop.f32.mrf.mxu1 }
 0x387   :  { %1017 = vst [vmem:[#allocation7 + $0x30] sm:$0xff] %v968_v38 }
 0x388   :  { %v972_v36 = vpop.f32.mrf.mxu1 }
 0x389   :  { %v973_v33 = vadd.f32 %v1062_v25, %v972_v36 }
 0x38a   :  { %v1431_v37 = vpop.f32.mrf.mxu1 }
 0x38b   :  { %1018 = vst [vmem:[#allocation7 + $0x38] sm:$0xff] %v973_v33 }
 0x38c   :  { %v977_v40 = vpop.f32.mrf.mxu1 }
 0x38d   :  { %v978_v42 = vadd.f32 %v1062_v25, %v977_v40 }
 0x38e   :  { %v1434_v41 = vpop.f32.mrf.mxu1 }
 0x38f   :  { %1019 = vst [vmem:[#allocation7 + $0x40] sm:$0xff] %v978_v42 }
 0x390   :  { %v982_v48 = vpop.f32.mrf.mxu1 }
 0x391   :  { %v983_v45 = vadd.f32 %v1062_v25, %v982_v48 }
 0x392   :  { %v1437_v46 = vpop.f32.mrf.mxu1 }
 0x393   :  { %1020 = vst [vmem:[#allocation7 + $0x48] sm:$0xff] %v983_v45 }
 0x394   :  { %v987_v47 = vpop.f32.mrf.mxu1 }
 0x395   :  { %v988_v49 = vadd.f32 %v1062_v25, %v987_v47 }
 0x396   :  { %v1440_v51 = vpop.f32.mrf.mxu1 }
 0x397   :  { %1021 = vst [vmem:[#allocation7 + $0x50] sm:$0xff] %v988_v49 }
 0x398   :  { %v992_v60 = vpop.f32.mrf.mxu1 }
 0x399   :  { %v993_v61 = vadd.f32 %v1062_v25, %v992_v60 }
 0x39a   :  { %v1443_v50 = vpop.f32.mrf.mxu1 }
 0x39b   :  { %1022 = vst [vmem:[#allocation7 + $0x58] sm:$0xff] %v993_v61 }
 0x39c   :  { %v997_v56 = vpop.f32.mrf.mxu1 }
 0x39d   :  { %v998_v52 = vadd.f32 %v1062_v25, %v997_v56 }
 0x39e   :  { %v1446_v62 = vpop.f32.mrf.mxu1 }
 0x39f   :  { %1023 = vst [vmem:[#allocation7 + $0x60] sm:$0xff] %v998_v52 }
 0x3a0   :  { %v1002_v15 = vpop.f32.mrf.mxu1 }
 0x3a1   :  { %v1003_v63 = vadd.f32 %v1062_v25, %v1002_v15 }
 0x3a2   :  { %v1449_v2 = vpop.f32.mrf.mxu1 }
 0x3a3   :  { %1024 = vst [vmem:[#allocation7 + $0x68] sm:$0xff] %v1003_v63 }
 0x3a4   :  { %v1007_v5 = vpop.f32.mrf.mxu1 }
 0x3a5   :  { %v1008_v3 = vadd.f32 %v1062_v25, %v1007_v5 }
 0x3a6   :  { %v1452_v7 = vpop.f32.mrf.mxu1 }
 0x3a7   :  { %1025 = vst [vmem:[#allocation7 + $0x70] sm:$0xff] %v1008_v3 }
 0x3a8   :  { %1635 = shalt.err (!%p1632_p0)
}
 0x3a9   :  { %1037 = dma.vmem_to_hbm [thread:$0]  %s1032_s8, 1920, %s2230_s7, [#allocation4], %s1651_s27, %s1651_s27, %s1652_s28  }
 0x3aa   :  { %1648 = dma.done.wait [#allocation4], 1920  }
 0x3ab   :  { %1649 = vsyncadd [#allocation4], 4294965376 }
 0x3ac   :  { %1041 = vsyncpa [#allocation3], 1 }
 0x3ad   :  { %1042 = vsyncpa [#allocation6], 1 }
 0x3ae   :  { %1043 = vsyncpa [#allocation4], 1 }

</bundles_post_ra>
